<compile_context>
chip_gen: v7x
topology: tpu7x:2x2x1
jax: 0.10.0
libtpu: 0.0.40
codegen_flags: <defaults>
</compile_context>

<pallas_src>
import jax
import jax.numpy as jnp
import numpy as np
from jax.experimental import pallas as pl
from jax.experimental.pallas import tpu as pltpu

FEATURE_SIZE = 256   # param['feature_size'] returned by select_resnet('resnet18')
HIDDEN = 128

# Generation-portable VMEM sizing (v7x has only 64 MiB/TC; v5e/v6e have 128 MiB).
_X_BUDGET = 3 << 20                 # padded bytes per streamed-x buffer (double-buffered)
_W_BUDGET = 4 << 20                 # padded bytes per weight-block buffer
_MAX_K_CHUNK = 8192                 # keeps unrolls / per-step MXU K-depth reasonable
_VMEM_LIMIT_BYTES = 48 * 1024 * 1024


def _orthogonal(key, rows, cols, gain):
    """Deterministic equivalent of torch.nn.init.orthogonal_(w, gain) for (rows, cols)."""
    a = jax.random.normal(key, (rows, cols), dtype=jnp.float32)
    flip = rows < cols
    if flip:
        a = a.T
    q, r = jnp.linalg.qr(a)
    d = jnp.sign(jnp.diag(r))
    d = jnp.where(d == 0, 1.0, d)          # guard sign(0) edge case
    q = q * d
    if flip:
        q = q.T
    return gain * q


# ---------------------------------------------------------------------------
# Padding-aware tiling helpers
# ---------------------------------------------------------------------------
def _round_up(x, m):
    return ((x + m - 1) // m) * m


def _pick_k_chunk(K, w_block_bytes, x_budget=_X_BUDGET, w_budget=_W_BUDGET,
                  max_k=_MAX_K_CHUNK):
    """Largest multiple-of-128 divisor of K (<= max_k) such that an 8-row x slab and the
    matching weight block both fit their padding-aware per-buffer budgets."""
    best = None
    c = 128
    limit = min(K, max_k)
    while c <= limit:
        if K % c == 0 and 8 * c * 4 <= x_budget and w_block_bytes(c) <= w_budget:
            best = c
        c += 128
    if best is None:
        best = K if K < 128 else 128
    return best


def _pick_row_chunk(rows, k_chunk, x_budget=_X_BUDGET):
    """Multiple-of-8 divisor of rows (or full rows) whose padded (rows, k_chunk) block fits
    the budget; prefers a choice giving >=2 row blocks (shards across v7x's 2 TCs)."""
    row_bytes = _round_up(k_chunk, 128) * 4
    cands = [d for d in range(8, rows + 1, 8) if rows % d == 0]
    if rows not in cands:
        cands.append(rows)
    fitting = [d for d in cands if _round_up(d, 8) * row_bytes <= x_budget]
    if not fitting:
        fitting = [min(cands)]      # k_chunk choice guarantees an 8-row slab fits
    split = [d for d in fitting if rows // d >= 2]
    return max(split) if split else max(fitting)


def _maybe_split_k(K, k_chunk, row_blocks):
    """Force >=2 grid steps so BlockSpec double-buffering actually overlaps DMA/compute."""
    if row_blocks == 1 and k_chunk == K and K >= 256:
        divs = [c for c in range(128, K, 128) if K % c == 0]
        if divs:
            return max(divs)
    return k_chunk


# ---------------------------------------------------------------------------
# linear_prob=True head:  x.mean(dim=(2,3,4)) -> Linear(N,128) -> ReLU -> Linear(128,1)
# Spatial mean folded into an expanded, lane-dense weight; main stream is an MXU matmul.
# ---------------------------------------------------------------------------
def _linear_head_kernel(x_ref, w1_ref, b1_ref, w2_ref, b2_ref, o_ref, acc_ref):
    k = pl.program_id(1)

    @pl.when(k == 0)
    def _():
        acc_ref[...] = jnp.zeros_like(acc_ref)

    # (b_chunk, k_chunk) @ (k_chunk, 128) on the MXU; pooling + Linear(N,128) fused.
    acc_ref[...] += jnp.dot(x_ref[...], w1_ref[...],
                            preferred_element_type=jnp.float32)

    @pl.when(k == pl.num_programs(1) - 1)
    def _():
        h = jnp.maximum(acc_ref[...] + b1_ref[...], 0.0)            # (b, 128) VPU
        # Linear(128,1) as broadcast-mul + single lane reduce (no width-1 MXU matmul).
        o_ref[...] = (jnp.sum(h * w2_ref[...], axis=1, keepdims=True)
                      + b2_ref[0]).astype(o_ref.dtype)


def linear_head(x, w1, b1, w2, b2):
    B, N, T, H, W = x.shape
    S = T * H * W
    K = N * S
    assert K % 128 == 0, "N*T*H*W must be a multiple of 128 (N=256 guarantees this)"
    x2 = x.reshape(B, K)                               # free row-major reshape of NCTHW
    # Fold the 1/S spatial mean into the expanded lane-dense weight: W1rep[c*S+s, j]=w1[j,c]/S
    w1rep = jnp.repeat(w1.T * (1.0 / S), S, axis=0)    # (K, 128)
    b1_row = b1.reshape(1, HIDDEN)
    w2_row = w2.reshape(1, HIDDEN)
    b2_s = b2.reshape(1,)

    # Larger weight budget here so typical encoder outputs (S <= 64) keep the expanded
    # weight in a single k-block (constant index_map => DMA'd exactly once).
    k_chunk = _pick_k_chunk(K, lambda c: _round_up(c, 8) * HIDDEN * 4,
                            w_budget=8 << 20, max_k=16384)
    b_chunk = _pick_row_chunk(B, k_chunk)
    k_chunk = _maybe_split_k(K, k_chunk, B // b_chunk)
    grid = (B // b_chunk, K // k_chunk)                # reduction (K) axis last

    return pl.pallas_call(
        _linear_head_kernel,
        out_shape=jax.ShapeDtypeStruct((B, 1), jnp.float32),
        grid=grid,
        in_specs=[
            pl.BlockSpec((b_chunk, k_chunk), lambda b, k: (b, k)),
            pl.BlockSpec((k_chunk, HIDDEN), lambda b, k: (k, 0)),
            pl.BlockSpec((1, HIDDEN), lambda b, k: (0, 0)),
            pl.BlockSpec((1, HIDDEN), lambda b, k: (0, 0)),
            pl.BlockSpec(memory_space=pltpu.MemorySpace.SMEM),      # scalar bias b2
        ],
        out_specs=pl.BlockSpec((b_chunk, 1), lambda b, k: (b, 0)),
        scratch_shapes=[pltpu.VMEM((b_chunk, HIDDEN), jnp.float32)],
        compiler_params=pltpu.CompilerParams(
            dimension_semantics=("parallel", "arbitrary"),
            vmem_limit_bytes=_VMEM_LIMIT_BYTES),
    )(x2, w1rep, b1_row, w2_row, b2_s)


# ---------------------------------------------------------------------------
# linear_prob=False head:  view -> Conv2d(N, N, 1x1) -> mean(dim=(1,2,3))
# Algebraic collapse: out[r] = sum_k x2[r,k]*w_row[k] + sum(bc)/N, streamed lane-dense.
# ---------------------------------------------------------------------------
def _conv_head_kernel(x_ref, w_ref, c_ref, o_ref, acc_ref):
    k = pl.program_id(1)

    @pl.when(k == 0)
    def _():
        acc_ref[...] = jnp.zeros_like(acc_ref)

    xw = x_ref[...] * w_ref[...]                       # (rows, k_chunk): pure VPU
    # Fold k_chunk lanes down to 128 with static 128-wide slices (VPU adds only);
    # the single cross-lane (XLU) reduce is deferred to the last-step epilogue.
    kc = x_ref.shape[1]
    part = xw[:, 0:128]
    for g in range(1, kc // 128):
        part = part + xw[:, g * 128:(g + 1) * 128]
    acc_ref[...] += part

    @pl.when(k == pl.num_programs(1) - 1)
    def _():
        o_ref[...] = (jnp.sum(acc_ref[...], axis=1, keepdims=True)
                      + c_ref[0]).astype(o_ref.dtype)


def conv_head(x, wc, bc):
    B, N, T, H, W = x.shape
    HW = H * W
    BT = B * T
    K = N * HW
    assert K % 128 == 0, "N*H*W must be a multiple of 128 (N=256 guarantees this)"
    # Exact torch view() semantics: (B,N,T,H,W)->view(B,T,N,H,W)->view(B*T,N,H,W) are pure
    # row-major reinterpretations, so the lane-dense 2D reshape below is free (no transpose).
    x2 = x.reshape(BT, K)
    w_row = (jnp.repeat(jnp.sum(wc, axis=0), HW) / (N * HW)).reshape(1, K)
    c_const = (jnp.sum(bc) / N).reshape(1,)

    k_chunk = _pick_k_chunk(K, lambda c: 8 * _round_up(c, 128) * 4)
    bt_chunk = _pick_row_chunk(BT, k_chunk)
    k_chunk = _maybe_split_k(K, k_chunk, BT // bt_chunk)
    grid = (BT // bt_chunk, K // k_chunk)              # reduction (K) axis last

    out = pl.pallas_call(
        _conv_head_kernel,
        out_shape=jax.ShapeDtypeStruct((BT, 1), jnp.float32),
        grid=grid,
        in_specs=[
            pl.BlockSpec((bt_chunk, k_chunk), lambda b, k: (b, k)),
            pl.BlockSpec((1, k_chunk), lambda b, k: (0, k)),
            pl.BlockSpec(memory_space=pltpu.MemorySpace.SMEM),      # folded scalar bias
        ],
        out_specs=pl.BlockSpec((bt_chunk, 1), lambda b, k: (b, 0)),
        scratch_shapes=[pltpu.VMEM((bt_chunk, 128), jnp.float32)],
        compiler_params=pltpu.CompilerParams(
            dimension_semantics=("parallel", "arbitrary"),
            vmem_limit_bytes=_VMEM_LIMIT_BYTES),
    )(x2, w_row, c_const)
    return out[:, 0]


def compass_model_forward(x, params, linear_prob=True):
    """CompassModel.forward minus the (external) encoder; x is the encoder output (B,N,T,H,W)."""
    if linear_prob:
        return linear_head(x, params["w1"], params["b1"], params["w2"], params["b2"])
    return conv_head(x, params["wc"], params["bc"])


def _reference(x, params, linear_prob):
    """Pure-JAX replica of the PyTorch head for correctness checking."""
    with jax.default_matmul_precision("float32"):
        if linear_prob:
            p = x.mean(axis=(2, 3, 4))
            h = jnp.maximum(p @ params["w1"].T + params["b1"], 0.0)
            return h @ params["w2"].T + params["b2"]
        B, N, T, H, W = x.shape
        x4 = x.reshape(B, T, N, H, W).reshape(B * T, N, H, W)   # same view() semantics
        y = jnp.einsum("oc,bchw->bohw", params["wc"], x4) + params["bc"][None, :, None, None]
        return y.mean(axis=(1, 2, 3))


if __name__ == "__main__":
    key = jax.random.PRNGKey(0)
    k_x, k_w1, k_w2, k_wc = jax.random.split(key, 4)

    B, T, H, W = 2, 2, 4, 4
    N = FEATURE_SIZE
    # Synthetic encoder feature map (what select_resnet('resnet18') would emit): (B,N,T,H,W)
    x = jax.random.normal(k_x, (B, N, T, H, W), dtype=jnp.float32)

    params = {
        "w1": _orthogonal(k_w1, HIDDEN, N, 0.1),      # nn.Linear(feature_size, 128).weight
        "b1": jnp.zeros((HIDDEN,), jnp.float32),      # biases initialized to 0
        "w2": _orthogonal(k_w2, 1, HIDDEN, 0.1),      # nn.Linear(128, 1).weight
        "b2": jnp.zeros((1,), jnp.float32),
        "wc": _orthogonal(k_wc, N, N, 0.1),           # nn.Conv2d(N, N, 1).weight (1x1 squeezed)
        "bc": jnp.zeros((N,), jnp.float32),
    }

    out_lin = jax.block_until_ready(compass_model_forward(x, params, linear_prob=True))
    out_conv = jax.block_until_ready(compass_model_forward(x, params, linear_prob=False))

    # Linear head streams through the MXU (possible reduced-precision passes for f32
    # operands), so use a matmul-appropriate tolerance; conv head is exact f32 VPU math.
    np.testing.assert_allclose(np.asarray(out_lin), np.asarray(_reference(x, params, True)),
                               rtol=1e-2, atol=1e-4)
    np.testing.assert_allclose(np.asarray(out_conv), np.asarray(_reference(x, params, False)),
                               rtol=1e-4, atol=2e-5)
    print("KERNEL_OK")
</pallas_src>

<mosaic_0001>
module attributes {stable_mosaic.version = 11 : i64} {
  func.func @_linear_head_kernel(%arg0: i32, %arg1: i32, %arg2: memref<2x4096xf32, #tpu.memory_space<vmem>>, %arg3: memref<4096x128xf32, #tpu.memory_space<vmem>>, %arg4: memref<1x128xf32, #tpu.memory_space<vmem>>, %arg5: memref<1x128xf32, #tpu.memory_space<vmem>>, %arg6: memref<1xf32, #tpu.memory_space<smem>>, %arg7: memref<2x1xf32, #tpu.memory_space<vmem>>, %arg8: memref<2x128xf32, #tpu.memory_space<vmem>>) attributes {dimension_semantics = [#tpu.dimension_semantics<parallel>, #tpu.dimension_semantics<arbitrary>], iteration_bounds = array<i64: 1, 2>, scalar_prefetch = 0 : i64, scratch_operands = 1 : i64, tpu.core_type = #tpu.core_type<tc>, window_params = [{transform_indices = @transform_0, window_bounds = array<i64: 2, 4096>}, {transform_indices = @transform_1, window_bounds = array<i64: 4096, 128>}, {pipeline_mode = #tpu.pipeline_mode<synchronous>, transform_indices = @transform_2, window_bounds = array<i64: 1, 128>}, {pipeline_mode = #tpu.pipeline_mode<synchronous>, transform_indices = @transform_3, window_bounds = array<i64: 1, 128>}, {transform_indices = @transform_4, window_bounds = array<i64: 1>}, {transform_indices = @transform_5, window_bounds = array<i64: 2, 1>}]} {
    %c0_i32 = arith.constant 0 : i32
    %0 = arith.cmpi eq, %arg1, %c0_i32 : i32
    %1 = arith.extui %0 : i1 to i32
    %c0_i32_0 = arith.constant 0 : i32
    %2 = arith.cmpi ne, %1, %c0_i32_0 : i32
    scf.if %2 {
      %cst_9 = arith.constant 0.000000e+00 : f32
      %12 = vector.broadcast %cst_9 : f32 to vector<2x128xf32>
      %c0_10 = arith.constant 0 : index
      %c0_11 = arith.constant 0 : index
      %13 = vector.load %arg8[%c0_10, %c0_11] : memref<2x128xf32, #tpu.memory_space<vmem>>, vector<2x128xf32>
      tpu.vector_store %arg8[%c0_10, %c0_11], %12 {strides = array<i32>} : memref<2x128xf32, #tpu.memory_space<vmem>>, vector<2x128xf32>,
    } else {
    }
    %c0 = arith.constant 0 : index
    %c0_1 = arith.constant 0 : index
    %3 = vector.load %arg8[%c0, %c0_1] : memref<2x128xf32, #tpu.memory_space<vmem>>, vector<2x128xf32>
    %c0_2 = arith.constant 0 : index
    %c0_3 = arith.constant 0 : index
    %4 = vector.load %arg2[%c0_2, %c0_3] : memref<2x4096xf32, #tpu.memory_space<vmem>>, vector<2x4096xf32>
    %c0_4 = arith.constant 0 : index
    %c0_5 = arith.constant 0 : index
    %5 = vector.load %arg3[%c0_4, %c0_5] : memref<4096x128xf32, #tpu.memory_space<vmem>>, vector<4096x128xf32>
    %cst = arith.constant dense<0.000000e+00> : vector<2x128xf32>
    %6 = tpu.matmul %4, %5, %cst {dimension_numbers = #tpu.dot_dimension_numbers<[1], [0], [0], [1], [0, 0, 1, 1], [], []>} : vector<2x4096xf32>, vector<4096x128xf32>, vector<2x128xf32> -> vector<2x128xf32>
    %7 = arith.addf %3, %6 : vector<2x128xf32>
    %c0_6 = arith.constant 0 : index
    %c0_7 = arith.constant 0 : index
    %8 = vector.load %arg8[%c0_6, %c0_7] : memref<2x128xf32, #tpu.memory_space<vmem>>, vector<2x128xf32>
    tpu.vector_store %arg8[%c0_6, %c0_7], %7 {strides = array<i32>} : memref<2x128xf32, #tpu.memory_space<vmem>>, vector<2x128xf32>,
    %c1_i32 = arith.constant 1 : i32
    %9 = arith.cmpi eq, %arg1, %c1_i32 : i32
    %10 = arith.extui %9 : i1 to i32
    %c0_i32_8 = arith.constant 0 : i32
    %11 = arith.cmpi ne, %10, %c0_i32_8 : i32
    scf.if %11 {
      %c0_9 = arith.constant 0 : index
      %c0_10 = arith.constant 0 : index
      %12 = vector.load %arg8[%c0_9, %c0_10] : memref<2x128xf32, #tpu.memory_space<vmem>>, vector<2x128xf32>
      %c0_11 = arith.constant 0 : index
      %c0_12 = arith.constant 0 : index
      %13 = vector.load %arg4[%c0_11, %c0_12] : memref<1x128xf32, #tpu.memory_space<vmem>>, vector<1x128xf32>
      %14 = vector.broadcast %13 : vector<1x128xf32> to vector<2x128xf32>
      %15 = arith.addf %12, %14 : vector<2x128xf32>
      %cst_13 = arith.constant 0.000000e+00 : f32
      %16 = vector.broadcast %cst_13 : f32 to vector<2x128xf32>
      %17 = arith.maximumf %15, %16 : vector<2x128xf32>
      %c0_14 = arith.constant 0 : index
      %c0_15 = arith.constant 0 : index
      %18 = vector.load %arg5[%c0_14, %c0_15] : memref<1x128xf32, #tpu.memory_space<vmem>>, vector<1x128xf32>
      %19 = vector.broadcast %18 : vector<1x128xf32> to vector<2x128xf32>
      %20 = arith.mulf %17, %19 : vector<2x128xf32>
      %cst_16 = arith.constant dense<0.000000e+00> : vector<2xf32>
      %21 = vector.multi_reduction <add>, %20, %cst_16 [1] : vector<2x128xf32> to vector<2xf32>
      %22 = vector.shape_cast %21 : vector<2xf32> to vector<2x1xf32>
      %c0_17 = arith.constant 0 : index
      %23 = memref.load %arg6[%c0_17] : memref<1xf32, #tpu.memory_space<smem>>
      %24 = vector.broadcast %23 : f32 to vector<2x1xf32>
      %25 = arith.addf %22, %24 : vector<2x1xf32>
      %c0_18 = arith.constant 0 : index
      %c0_19 = arith.constant 0 : index
      %26 = vector.load %arg7[%c0_18, %c0_19] : memref<2x1xf32, #tpu.memory_space<vmem>>, vector<2x1xf32>
      tpu.vector_store %arg7[%c0_18, %c0_19], %25 {strides = array<i32>} : memref<2x1xf32, #tpu.memory_space<vmem>>, vector<2x1xf32>,
    } else {
    }
    return
  }
  func.func @transform_0(%arg0: i32, %arg1: i32) -> (i32, i32) {
    %c0_i32 = arith.constant 0 : i32
    return %arg0, %arg1 : i32, i32
  }
  func.func @transform_1(%arg0: i32, %arg1: i32) -> (i32, i32) {
    %c0_i32 = arith.constant 0 : i32
    %c0_i32_0 = arith.constant 0 : i32
    return %arg1, %c0_i32 : i32, i32
  }
  func.func @transform_2(%arg0: i32, %arg1: i32) -> (i32, i32) {
    %c0_i32 = arith.constant 0 : i32
    %c0_i32_0 = arith.constant 0 : i32
    %c0_i32_1 = arith.constant 0 : i32
    return %c0_i32, %c0_i32_0 : i32, i32
  }
  func.func @transform_3(%arg0: i32, %arg1: i32) -> (i32, i32) {
    %c0_i32 = arith.constant 0 : i32
    %c0_i32_0 = arith.constant 0 : i32
    %c0_i32_1 = arith.constant 0 : i32
    return %c0_i32, %c0_i32_0 : i32, i32
  }
  func.func @transform_4(%arg0: i32, %arg1: i32) -> i32 {
    %c0_i32 = arith.constant 0 : i32
    %c0_i32_0 = arith.constant 0 : i32
    return %c0_i32 : i32
  }
  func.func @transform_5(%arg0: i32, %arg1: i32) -> (i32, i32) {
    %c0_i32 = arith.constant 0 : i32
    %c0_i32_0 = arith.constant 0 : i32
    return %arg0, %c0_i32 : i32, i32
  }
}

</mosaic_0001>

<bundles_post_ra>
// kernel: tpu_custom_call.1
= control target key start
LH: loop header
LB: loop body
LE: loop exit
PB: predicated region body
PF: predicated region fallthrough
CT: control target
= control target key end

     0   :  { %s4565_s0 = inlined_call_operand.hbm [shape: f32[2,8192], index: 0, kind: input, shape index: {}]   ;;  %s4566_s1 = inlined_call_operand.hbm [shape: f32[8192,128], index: 1, kind: input, shape index: {}]   ;;  %s4567_s2 = inlined_call_operand.hbm [shape: f32[1,128], index: 2, kind: input, shape index: {}]   ;;  %s4568_s3 = inlined_call_operand.hbm [shape: f32[1,128], index: 3, kind: input, shape index: {}]   ;;  %s4569_s4 = inlined_call_operand.<no memory space> [shape: f32[1], index: 4, kind: input, shape index: {}]   ;;  %s4570_s5 = inlined_call_operand.vmem [shape: f32[2,1], index: 5, kind: output, shape index: {}]  }
   0x1   :  { %10 = sst [smem:[#allocation3]] %s4569_s4 }
   0x2   :  { %11 = vsyncpa [#allocation5], 0 }
   0x3   :  { %13 = vsyncpa [#allocation5 + $0x1], 0 }
   0x4   :  { %14 = vsyncpa [#allocation7], 0 }
   0x5   :  { %16 = vsyncpa [#allocation7 + $0x1], 0 }
   0x6   :  { %17 = vsyncpa [#allocation10], 0  ;;  %s3706_s20 = smov 0   ;;  %s3708_s21 = smov 0  }
   0x7   :  { %s3710_s22 = smov 0   ;;  %s3712_s23 = smov 0  }
   0x8   :  { %s3714_s24 = smov 0   ;;  %s3716_s25 = smov 0  }
   0x9 LB: > { %s2295_s4 = sadd.s32 4294967295, %s3663_s25   ;;  %p57_p0 = scmp.ne.s32.totalorder %s3647_s21, %s3643_s20  ;;  %s3663_s25 = sphi %s3716_s25, %s23_s25   ;;  %s3659_s24 = sphi %s3714_s24, %s4588_s24   ;;  %s3655_s23 = sphi %s3712_s23, %s4587_s23   ;;  %s3651_s22 = sphi %s3710_s22, %s4586_s22   ;;  %s3647_s21 = sphi %s3708_s21, %s4585_s21   ;;  %s3643_s20 = sphi %s3706_s20, %s4584_s20  }
   0xa   : > { %p3738_p1 = scmp.eq.s32.totalorder %s2295_s4, 0  ;;  %p2296_p2 = scmp.ge.s32.totalorder %s3663_s25, 1 }
   0xb   : > { %p183_p3 = scmp.lt.s32.totalorder %s3663_s25, 3  ;;  %s3665_s29 = smov [#allocation8]  }
   0xc   : > { %s4575_s26 = scalar_select %p3738_p1, 1, 0 }
   0xd   : > { %p3746_p4 = por %p3738_p1, %p57_p0  ;;  %p3750_p5 = pnand %p2296_p2, %p183_p3 }
   0xe   : > { %s196_s30 = sshll.u32 %s3665_s29, 4  ;;  %s3666_s6 = smov [#allocation9]   ;;  %s197_s30 = int_to_ptr.vmem [resolvable:$true] %s196_s30 }
   0xf   : > { %s4576_s27 = scalar_select %p3746_p4, 1, 0 }
  0x10   : > { %s4577_s28 = scalar_select %p3750_p5, 1, 0 }
  0x11   : > { %p3404_p6 = pneg %p3750_p5  ;;  %s207_s7 = sshll.u32 %s3666_s6, 4  ;;  %s3762_s7 = int_to_ptr.vmem [resolvable:$true] %s207_s7 }
  0x12   : > { %s3485_s11 = scalar_lea.hbm %s4567_s2, 16 }
  0x13   : > { %p3758_p7 = pnand %p3404_p6, %p3738_p1  ;;  %p3486_p8 = scmp.ne.s32.totalorder %s4567_s2, %s3485_s11 }
  0x14   : > { %p3492_p12 = scmp.lt.u32.totalorder %s3485_s11, %s4567_s2 }
  0x15   : > { %p3487_p9 = pneg %p3758_p7 }
  0x17   : > { %p3488_p10 = pnand %p3487_p9, %p3486_p8 }
  0x19   : > { %p3489_p11 = pneg %p3488_p10 }
  0x1b   : > { %p3494_p13 = pnand %p3492_p12, %p3489_p11 }
  0x1d   : > { %3497 = shalt.err (!%p3494_p13)
}
  0x1e   : > { %s3498_s16 = scalar_lea.vmem %s197_s30, 16  ;;  %s3505_s17 = scalar_lea.vmem %s197_s30, 32 }
  0x1f   : > { %p3499_p0 = scmp.ne.s32.totalorder %s197_s30, %s3498_s16  ;;  %p3506_p6 = scmp.lt.s32.totalorder %s197_s30, %s197_s30 }
  0x20   : > { %p3507_p1 = scmp.lt.s32.totalorder %s3505_s17, %s3498_s16 }
  0x21   : > { %p3501_p2 = pnand %p3499_p0, %p3487_p9 }
  0x22   : > { %p3508_p4 = por %p3507_p1, %p3506_p6 }
  0x23   : > { %p3502_p3 = pneg %p3501_p2 }
  0x25   : > { %p3509_p5 = pnand %p3508_p4, %p3502_p3 }
  0x27   : > { %3512 = shalt.err (!%p3509_p5)
}
  0x28   : > { %3407 = dma.hbm_to_vmem [thread:$0]  (!%p3758_p7), %s4567_s2, 16, %s197_s30, [#allocation7]  }
  0x29   : > { %s3513_s6 = scalar_lea.hbm %s4568_s3, 16 }
  0x2a   : > { %p3514_p8 = scmp.ne.s32.totalorder %s4568_s3, %s3513_s6  ;;  %p3520_p5 = scmp.lt.u32.totalorder %s3513_s6, %s4568_s3 }
  0x2c   : > { %p3516_p1 = pnand %p3514_p8, %p3487_p9 }
  0x2e   : > { %p3517_p4 = pneg %p3516_p1 }
  0x30   : > { %p3522_p10 = pnand %p3520_p5, %p3517_p4 }
  0x32   : > { %3525 = shalt.err (!%p3522_p10)
}
  0x33   : > { %s3526_s30 = scalar_lea.vmem %s3762_s7, 16  ;;  %s3533_s13 = scalar_lea.vmem %s3762_s7, 32 }
  0x34   : > { %p3527_p11 = scmp.ne.s32.totalorder %s3762_s7, %s3526_s30  ;;  %p3534_p0 = scmp.lt.s32.totalorder %s3762_s7, %s3762_s7 }
  0x35   : > { %p3535_p2 = scmp.lt.s32.totalorder %s3533_s13, %s3526_s30 }
  0x36   : > { %p3529_p12 = pnand %p3527_p11, %p3487_p9 }
  0x37   : > { %p3536_p3 = por %p3535_p2, %p3534_p0 }
  0x38   : > { %p3530_p13 = pneg %p3529_p12 }
  0x3a   : > { %p3537_p6 = pnand %p3536_p3, %p3530_p13 }
  0x3c   : > { %3540 = shalt.err (!%p3537_p6)
}
  0x3d   : > { %3410 = dma.hbm_to_vmem [thread:$0]  (!%p3758_p7), %s4568_s3, 16, %s3762_s7, [#allocation10]  }
  0x3e   : > { %s32_s16 = sadd.s32 1, %s3659_s24  ;;  %s44_s17 = sadd.s32 1, %s3651_s22 }
  0x3f   : > { %p33_p9 = scmp.ge.s32.totalorder %s32_s16, 2  ;;  %p51_p8 = scmp.ne.s32.totalorder %s3651_s22, %s3647_s21 }
  0x40   : > { %p52_p1 = scmp.eq.s32.totalorder %s3663_s25, 0  ;;  %p3420_p4 = scmp.lt.s32.totalorder %s3663_s25, 2 }
  0x41   : > { %s4590_s16 = smov (%p33_p9, %s32_s16), 0  ;;  %s3821_s8 = sand.u32 1, %s3651_s22  }
  0x42   : > { %p53_p5 = por %p52_p1, %p51_p8  ;;  %s40_s18 = ssub.s32 %s3659_s24, %s4590_s16 }
  0x43   : > { %p42_p10 = scmp.eq.s32.totalorder %s40_s18, 0  ;;  %s2300_s7 = sshll.u32 %s3821_s8, 6 }
  0x44   : > { %s2318_s19 = sshll.u32 %s3659_s24, 10  ;;  %s225_s10 = scalar_lea.vmem [#allocation4], %s2300_s7 }
  0x45   : > { %s3828_s20 = scalar_select %p42_p10, %s3651_s22, %s44_s17  }
  0x46   : > { %s3833_s9 = scalar_lea.hbm %s4565_s0, %s2318_s19  ;;  %s235_s11 = sshll.u32 %s225_s10, 4  ;;  %s3835_s11 = int_to_ptr.vmem [resolvable:$true] %s235_s11 }
  0x47   : > { %p3839_p7 = pnand %p3420_p4, %p53_p5  ;;  %s2303_s30 = sshll.u32 %s3821_s8, 12 }
  0x48   : > { %s2319_s13 = sshll.u32 %s3659_s24, 16  ;;  %s222_s14 = scalar_lea.sflag [#allocation5], %s3821_s8 }
  0x49   : > { %s3541_s15 = scalar_lea.hbm %s3833_s9, 1024  ;;  %p3543_p12 = pneg %p3839_p7 }
  0x4a   : > { %p3542_p11 = scmp.ne.s32.totalorder %s3833_s9, %s3541_s15  ;;  %s3546_s7 = scalar_lea.hbm %s4565_s0, 2048 }
  0x4b   : > { %p3547_p2 = scmp.lt.u32.totalorder %s3833_s9, %s4565_s0  ;;  %p3548_p3 = scmp.lt.u32.totalorder %s3546_s7, %s3541_s15 }
  0x4c   : > { %p3544_p13 = pnand %p3543_p12, %p3542_p11  ;;  %p3550_p9 = scmp.lt.u32.totalorder %s3541_s15, %s3833_s9 }
  0x4d   : > { %p3549_p6 = por %p3548_p3, %p3547_p2 }
  0x4e   : > { %p3545_p0 = pneg %p3544_p13 }
  0x4f   : > { %p3551_p8 = por %p3550_p9, %p3549_p6 }
  0x51   : > { %p3552_p1 = pnand %p3551_p8, %p3545_p0 }
  0x53   : > { %3555 = shalt.err (!%p3552_p1)
}
  0x54   : > { %s3556_s6 = scalar_lea.vmem %s3835_s11, 1024  ;;  %s3667_s10 = smov [#allocation4]  }
  0x55   : > { %p3557_p4 = scmp.ne.s32.totalorder %s3835_s11, %s3556_s6  ;;  %s3561_s17 = sshll.u32 %s3667_s10, 4  ;;  %s3562_s17 = int_to_ptr.vmem [resolvable:$false] %s3561_s17 }
  0x56   : > { %s3563_s18 = scalar_lea.vmem %s3562_s17, 2048  ;;  %p3564_p11 = scmp.lt.s32.totalorder %s3835_s11, %s3562_s17 }
  0x57   : > { %p3559_p5 = pnand %p3557_p4, %p3543_p12  ;;  %p3565_p13 = scmp.lt.s32.totalorder %s3563_s18, %s3556_s6 }
  0x59   : > { %p3560_p10 = pneg %p3559_p5  ;;  %p3566_p2 = por %p3565_p13, %p3564_p11 }
  0x5b   : > { %p3567_p3 = pnand %p3566_p2, %p3560_p10 }
  0x5d   : > { %3570 = shalt.err (!%p3567_p3)
}
  0x5e   : > { %3414 = dma.hbm_to_vmem [thread:$0]  (!%p3839_p7), %s3833_s9, 1024, %s3835_s11, %s222_s14  }
  0x5f   : > { %s246_s15 = scalar_lea.vmem [#allocation6], %s2303_s30  ;;  %s242_s19 = sand.u32 1, %s3663_s25  }
  0x60   : > { %s253_s7 = sshll.u32 %s246_s15, 4  ;;  %s3881_s10 = scalar_lea.hbm %s4566_s1, %s2319_s13  ;;  %s3874_s7 = int_to_ptr.vmem [resolvable:$true] %s253_s7 }
  0x61   : > { %s3883_s17 = scalar_lea.sflag [#allocation7], %s242_s19  ;;  %s3571_s18 = scalar_lea.hbm %s3881_s10, 65536 }
  0x62   : > { %p3572_p0 = scmp.ne.s32.totalorder %s3881_s10, %s3571_s18  ;;  %s3576_s11 = scalar_lea.hbm %s4566_s1, 131072 }
  0x63   : > { %p3577_p8 = scmp.lt.u32.totalorder %s3881_s10, %s4566_s1  ;;  %p3578_p1 = scmp.lt.u32.totalorder %s3576_s11, %s3571_s18 }
  0x64   : > { %p3574_p6 = pnand %p3572_p0, %p3543_p12  ;;  %p3580_p5 = scmp.lt.u32.totalorder %s3571_s18, %s3881_s10 }
  0x65   : > { %p3579_p4 = por %p3578_p1, %p3577_p8 }
  0x66   : > { %p3575_p9 = pneg %p3574_p6 }
  0x67   : > { %p3581_p10 = por %p3580_p5, %p3579_p4 }
  0x69   : > { %p3582_p11 = pnand %p3581_p10, %p3575_p9 }
  0x6b   : > { %3585 = shalt.err (!%p3582_p11)
}
  0x6c   : > { %s3586_s13 = scalar_lea.vmem %s3874_s7, 65536  ;;  %s3668_s15 = smov [#allocation6]  }
  0x6d   : > { %p3587_p13 = scmp.ne.s32.totalorder %s3874_s7, %s3586_s13  ;;  %s3591_s19 = sshll.u32 %s3668_s15, 4  ;;  %s3592_s19 = int_to_ptr.vmem [resolvable:$false] %s3591_s19 }
  0x6e   : > { %s3593_s29 = scalar_lea.vmem %s3592_s19, 131072  ;;  %p3594_p0 = scmp.lt.s32.totalorder %s3874_s7, %s3592_s19 }
  0x6f   : > { %p3589_p2 = pnand %p3587_p13, %p3543_p12  ;;  %p3595_p6 = scmp.lt.s32.totalorder %s3593_s29, %s3586_s13 }
  0x71   : > { %p3590_p3 = pneg %p3589_p2  ;;  %p3596_p8 = por %p3595_p6, %p3594_p0 }
  0x73   : > { %p3597_p1 = pnand %p3596_p8, %p3590_p3 }
  0x75   : > { %3600 = shalt.err (!%p3597_p1)
}
  0x76   : > { %s3669_s6 = smov 128   ;;  %s3670_s18 = smov 8  }
  0x77   : > { %3417 = dma.hbm_to_vmem [thread:$0]  (!%p3839_p7), %s3881_s10, 65536, %s3874_s7, %s3883_s17, %s3669_s6, %s3669_s6, %s3670_s18  }
  0x78   : > { %p4580_p12 = scmp.ne.s32.totalorder %s4577_s28, 0 }
  0x79   : > { %s267_s8 = sand.u32 (!%p4580_p12), 1, %s3647_s21   ;;  %p4581_p9 = scmp.ne.s32.totalorder (!%p4580_p12), %s4576_s27, 0 }
  0x7a   : > { %265 = sbr.rel (%p4580_p12) target bundleno = 788 (0x314), region = 40  ;;  %s2307_s9 = sshll.u32 (!%p4580_p12), %s267_s8, 6 }
  0x7b   : > { %s268_s11 = scalar_lea.sflag (!%p4580_p12), [#allocation5], %s267_s8  ;;  %s3912_s30 = scalar_lea.vmem (!%p4580_p12), [#allocation4], %s2307_s9 }
  0x81   : > { %3626 = dma.done.wait (%p4581_p9), %s268_s11, 1024  }
  0x82   : > { %3628 = vsyncadd (%p4581_p9), %s268_s11, 4294966272  ;;  %s276_s12 = sand.u32 1, %s2295_s4   ;;  %s2308_s7 = sshll.u32 %s267_s8, 12 }
  0x83   : > { %s277_s10 = scalar_lea.sflag [#allocation7], %s276_s12  ;;  %s3920_s28 = scalar_lea.vmem [#allocation6], %s2308_s7 }
  0x84   : > { %3630 = dma.done.wait (%p4581_p9), %s277_s10, 65536  }
  0x85   : > { %3632 = vsyncadd (%p4581_p9), %s277_s10, 4294901760  ;;  %p4582_p7 = scmp.ne.s32.totalorder %s4575_s26, 0 }
  0x87   : > { %3634 = dma.done.wait (%p4582_p7), [#allocation7], 16  }
  0x88   : > { %3636 = vsyncadd (%p4582_p7), [#allocation7], 4294967280 }
  0x89   : > { %3638 = dma.done.wait (%p4582_p7), [#allocation10], 16  }
  0x8a   : > { %3640 = vsyncadd (%p4582_p7), [#allocation10], 4294967280  ;;  %p2311_p4 = scmp.ne.s32.totalorder %s3655_s23, 0 }
  0x8b   : > { %v3671_v0 = vmov (!%p2311_p4), 0.0  }
  0x8c   : > { %328 = sbr.rel (%p2311_p4) target bundleno = 147 (0x93), region = 60  ;;  %329 = vst [vmem:[#allocation2] sm:$0x3] (!%p2311_p4), %v3671_v0 }
  0x93 PF: > { %v355_v1 = vld [vmem:[%s3920_s28 + $0x80] sm:$0xff]  ;;  %v356_v2 = vld [vmem:[%s3920_s28 + $0x88] sm:$0xff]  ;;  %v357_v12 = vld [vmem:[%s3920_s28 + $0x90] sm:$0xff]  ;;  %v3672_v48 = vmov 1983009808   ;;  %v863_v50 = vlaneseq  ;;  %p2312_p5 = scmp.ne.s32.totalorder %s3655_s23, 1 }
  0x94   : > { %v387_v3 = vld [vmem:[%s3920_s28 + $0x180] sm:$0xff]  ;;  %v2880_v4 = vpack.c.bf16 %v356_v2, %v355_v1  ;;  %v388_v5 = vld [vmem:[%s3920_s28 + $0x188] sm:$0xff]  ;;  %v358_v14 = vld [vmem:[%s3920_s28 + $0x98] sm:$0xff]  ;;  %v861_v49 = vunpack.c.l.s4 %v3672_v48  ;;  %vm2171_vm0 = vcmask (!%p2312_p5), 1041408   ;;  %s2175_s4 = sld [smem:[#allocation3]] (!%p2312_p5)  ;;  %vm2178_vm1 = vcmask (!%p2312_p5), 1024  }
  0x95   : > { %v339_v6 = vld [vmem:[%s3920_s28] sm:$0xff]  ;;  %v340_v7 = vld [vmem:[%s3920_s28 + $0x8] sm:$0xff]  ;;  %v2912_v8 = vpack.c.bf16 %v388_v5, %v387_v3  ;;  %v389_v15 = vld [vmem:[%s3920_s28 + $0x190] sm:$0xff]  ;;  %v2884_v17 = vpack.c.bf16 %v358_v14, %v357_v12  ;;  %v864_v1 = vshrl.u32 %v863_v50, 7 }
  0x96   : > { %v2882_v9 = vpack.c.bf16 %v340_v7, %v339_v6  ;;  %v371_v10 = vld [vmem:[%s3920_s28 + $0x100] sm:$0xff]  ;;  %v372_v11 = vld [vmem:[%s3920_s28 + $0x108] sm:$0xff]  ;;  %2881 = vmatprep.subr.bf16.mxu0 %v2880_v4  ;;  %v390_v16 = vld [vmem:[%s3920_s28 + $0x198] sm:$0xff]  ;;  %v862_v0 = vunpack.c.0.s8 %v861_v49 }
  0x97   : > { %v2914_v13 = vpack.c.bf16 %v372_v11, %v371_v10  ;;  %2913 = vmatprep.subr.bf16.mxu1 %v2912_v8  ;;  %v2916_v18 = vpack.c.bf16 %v390_v16, %v389_v15  ;;  %v341_v19 = vld [vmem:[%s3920_s28 + $0x10] sm:$0xff]  ;;  %v342_v20 = vld [vmem:[%s3920_s28 + $0x18] sm:$0xff]  ;;  %v359_v24 = vld [vmem:[%s3920_s28 + $0xa0] sm:$0xff] }
  0x98   : > { %2883 = vmatpush3.bf16.msra.mxu0 %v2882_v9  ;;  %v373_v21 = vld [vmem:[%s3920_s28 + $0x110] sm:$0xff]  ;;  %v2886_v22 = vpack.c.bf16 %v342_v20, %v341_v19  ;;  %v374_v23 = vld [vmem:[%s3920_s28 + $0x118] sm:$0xff]  ;;  %v360_v25 = vld [vmem:[%s3920_s28 + $0xa8] sm:$0xff]  ;;  %v3985_v14 = vsub.s32 %v862_v0, %v864_v1 }
  0x99   : > { %2915 = vmatpush3.bf16.msra.mxu1 %v2914_v13  ;;  %2885 = vmatprep.subr.bf16.mxu0 %v2884_v17  ;;  %v2918_v26 = vpack.c.bf16 %v374_v23, %v373_v21  ;;  %v2888_v27 = vpack.c.bf16 %v360_v25, %v359_v24  ;;  %v391_v28 = vld [vmem:[%s3920_s28 + $0x1a0] sm:$0xff]  ;;  %v392_v29 = vld [vmem:[%s3920_s28 + $0x1a8] sm:$0xff]  ;;  %v361_v36 = vld [vmem:[%s3920_s28 + $0xb0] sm:$0xff] }
  0x9a   : > { %2917 = vmatprep.subr.bf16.mxu1 %v2916_v18  ;;  %v343_v30 = vld [vmem:[%s3920_s28 + $0x20] sm:$0xff]  ;;  %v2920_v31 = vpack.c.bf16 %v392_v29, %v391_v28  ;;  %v344_v32 = vld [vmem:[%s3920_s28 + $0x28] sm:$0xff]  ;;  %v362_v37 = vld [vmem:[%s3920_s28 + $0xb8] sm:$0xff] }
  0x9b   : > { %v375_v33 = vld [vmem:[%s3920_s28 + $0x120] sm:$0xff]  ;;  %v376_v34 = vld [vmem:[%s3920_s28 + $0x128] sm:$0xff]  ;;  %v2890_v35 = vpack.c.bf16 %v344_v32, %v343_v30  ;;  %v393_v38 = vld [vmem:[%s3920_s28 + $0x1b0] sm:$0xff]  ;;  %v2892_v40 = vpack.c.bf16 %v362_v37, %v361_v36 }
  0x9c   : > { %2887 = vmatpush3.bf16.msra.mxu0 %v2886_v22  ;;  %v2922_v39 = vpack.c.bf16 %v376_v34, %v375_v33  ;;  %v394_v41 = vld [vmem:[%s3920_s28 + $0x1b8] sm:$0xff]  ;;  %v345_v42 = vld [vmem:[%s3920_s28 + $0x30] sm:$0xff]  ;;  %v363_v47 = vld [vmem:[%s3920_s28 + $0xc0] sm:$0xff] }
  0x9d   : > { %2919 = vmatpush3.bf16.msra.mxu1 %v2918_v26  ;;  %2889 = vmatprep.subr.bf16.mxu0 %v2888_v27  ;;  %v346_v43 = vld [vmem:[%s3920_s28 + $0x38] sm:$0xff]  ;;  %v2924_v44 = vpack.c.bf16 %v394_v41, %v393_v38  ;;  %v377_v45 = vld [vmem:[%s3920_s28 + $0x130] sm:$0xff]  ;;  %v364_v51 = vld [vmem:[%s3920_s28 + $0xc8] sm:$0xff] }
  0x9e   : > { %2921 = vmatprep.subr.bf16.mxu1 %v2920_v31  ;;  %v378_v46 = vld [vmem:[%s3920_s28 + $0x138] sm:$0xff]  ;;  %v395_v52 = vld [vmem:[%s3920_s28 + $0x1c0] sm:$0xff]  ;;  %v396_v53 = vld [vmem:[%s3920_s28 + $0x1c8] sm:$0xff]  ;;  %v2894_v54 = vpack.c.bf16 %v346_v43, %v345_v42  ;;  %v2896_v56 = vpack.c.bf16 %v364_v51, %v363_v47 }
  0x9f   : > { %v2926_v55 = vpack.c.bf16 %v378_v46, %v377_v45  ;;  %v347_v57 = vld [vmem:[%s3920_s28 + $0x40] sm:$0xff]  ;;  %v348_v58 = vld [vmem:[%s3920_s28 + $0x48] sm:$0xff]  ;;  %v2928_v60 = vpack.c.bf16 %v396_v53, %v395_v52  ;;  %v365_v62 = vld [vmem:[%s3920_s28 + $0xd0] sm:$0xff] }
  0xa0   : > { %2891 = vmatpush3.bf16.msra.mxu0 %v2890_v35  ;;  %v379_v59 = vld [vmem:[%s3920_s28 + $0x140] sm:$0xff]  ;;  %v380_v61 = vld [vmem:[%s3920_s28 + $0x148] sm:$0xff]  ;;  %v366_v63 = vld [vmem:[%s3920_s28 + $0xd8] sm:$0xff]  ;;  %v2898_v4 = vpack.c.bf16 %v348_v58, %v347_v57 }
  0xa1   : > { %2923 = vmatpush3.bf16.msra.mxu1 %v2922_v39  ;;  %2893 = vmatprep.subr.bf16.mxu0 %v2892_v40  ;;  %v397_v2 = vld [vmem:[%s3920_s28 + $0x1d0] sm:$0xff]  ;;  %v398_v3 = vld [vmem:[%s3920_s28 + $0x1d8] sm:$0xff]  ;;  %v2930_v5 = vpack.c.bf16 %v380_v61, %v379_v59  ;;  %v2900_v6 = vpack.c.bf16 %v366_v63, %v365_v62  ;;  %v367_v12 = vld [vmem:[%s3920_s28 + $0xe0] sm:$0xff] }
  0xa2   : > { %2925 = vmatprep.subr.bf16.mxu1 %v2924_v44  ;;  %v349_v7 = vld [vmem:[%s3920_s28 + $0x50] sm:$0xff]  ;;  %v350_v8 = vld [vmem:[%s3920_s28 + $0x58] sm:$0xff]  ;;  %v2932_v10 = vpack.c.bf16 %v398_v3, %v397_v2  ;;  %v368_v13 = vld [vmem:[%s3920_s28 + $0xe8] sm:$0xff] }
  0xa3   : > { %v381_v9 = vld [vmem:[%s3920_s28 + $0x150] sm:$0xff]  ;;  %v382_v11 = vld [vmem:[%s3920_s28 + $0x158] sm:$0xff]  ;;  %v399_v15 = vld [vmem:[%s3920_s28 + $0x1e0] sm:$0xff]  ;;  %v2902_v17 = vpack.c.bf16 %v350_v8, %v349_v7  ;;  %v2904_v20 = vpack.c.bf16 %v368_v13, %v367_v12 }
  0xa4   : > { %2895 = vmatpush3.bf16.msra.mxu0 %v2894_v54  ;;  %v400_v16 = vld [vmem:[%s3920_s28 + $0x1e8] sm:$0xff]  ;;  %v351_v18 = vld [vmem:[%s3920_s28 + $0x60] sm:$0xff]  ;;  %v2934_v19 = vpack.c.bf16 %v382_v11, %v381_v9  ;;  %v369_v26 = vld [vmem:[%s3920_s28 + $0xf0] sm:$0xff] }
  0xa5   : > { %2927 = vmatpush3.bf16.msra.mxu1 %v2926_v55  ;;  %2897 = vmatprep.subr.bf16.mxu0 %v2896_v56  ;;  %v352_v21 = vld [vmem:[%s3920_s28 + $0x68] sm:$0xff]  ;;  %v383_v22 = vld [vmem:[%s3920_s28 + $0x160] sm:$0xff]  ;;  %v2936_v24 = vpack.c.bf16 %v400_v16, %v399_v15  ;;  %v370_v27 = vld [vmem:[%s3920_s28 + $0xf8] sm:$0xff] }
  0xa6   : > { %2929 = vmatprep.subr.bf16.mxu1 %v2928_v60  ;;  %v331_v23 = vld [vmem:[%s3912_s30] sm:$0xff]  ;;  %v384_v25 = vld [vmem:[%s3920_s28 + $0x168] sm:$0xff]  ;;  %v401_v30 = vld [vmem:[%s3920_s28 + $0x1f0] sm:$0xff]  ;;  %v2906_v32 = vpack.c.bf16 %v352_v21, %v351_v18  ;;  %v2908_v36 = vpack.c.bf16 %v370_v27, %v369_v26 }
  0xa7   : > { %v866_v28 = vrot.slane %v331_v23, %v3985_v14  ;;  %v859_v29 = vcombine.high %v331_v23, %v331_v23  ;;  %v402_v31 = vld [vmem:[%s3920_s28 + $0x1f8] sm:$0xff]  ;;  %v2938_v35 = vpack.c.bf16 %v384_v25, %v383_v22  ;;  %v353_v37 = vld [vmem:[%s3920_s28 + $0x70] sm:$0xff]  ;;  %v419_v43 = vld [vmem:[%s3920_s28 + $0x280] sm:$0xff] }
  0xa8   : > { %2899 = vmatpush3.bf16.msra.mxu0 %v2898_v4  ;;  %v354_v38 = vld [vmem:[%s3920_s28 + $0x78] sm:$0xff]  ;;  %v385_v39 = vld [vmem:[%s3920_s28 + $0x170] sm:$0xff]  ;;  %v2940_v40 = vpack.c.bf16 %v402_v31, %v401_v30  ;;  %v420_v44 = vld [vmem:[%s3920_s28 + $0x288] sm:$0xff] }
  0xa9   : > { %2931 = vmatpush3.bf16.msra.mxu1 %v2930_v5  ;;  %2901 = vmatprep.subr.bf16.mxu0 %v2900_v6  ;;  %v874_v33 = vcombine.high %v866_v28, %v866_v28  ;;  %v873_v34 = vrot.slane %v859_v29, %v3985_v14  ;;  %v386_v41 = vld [vmem:[%s3920_s28 + $0x178] sm:$0xff]  ;;  %v451_v45 = vld [vmem:[%s3920_s28 + $0x380] sm:$0xff]  ;;  %v452_v46 = vld [vmem:[%s3920_s28 + $0x388] sm:$0xff]  ;;  %v2910_v47 = vpack.c.bf16 %v354_v38, %v353_v37 }
  0xaa   : > { %2933 = vmatprep.subr.bf16.mxu1 %v2932_v10  ;;  %v2942_v48 = vpack.c.bf16 %v386_v41, %v385_v39  ;;  %v2944_v49 = vpack.c.bf16 %v420_v44, %v419_v43  ;;  %v403_v50 = vld [vmem:[%s3920_s28 + $0x200] sm:$0xff]  ;;  %v404_v51 = vld [vmem:[%s3920_s28 + $0x208] sm:$0xff]  ;;  %v2976_v53 = vpack.c.bf16 %v452_v46, %v451_v45  ;;  %v421_v55 = vld [vmem:[%s3920_s28 + $0x290] sm:$0xff] }
  0xab   : > { %1091 = vmatprep.mubr.f32.mxu0 %v874_v33  ;;  %v875_v42 = vcombine.high %v873_v34, %v873_v34  ;;  %v435_v52 = vld [vmem:[%s3920_s28 + $0x300] sm:$0xff]  ;;  %v436_v54 = vld [vmem:[%s3920_s28 + $0x308] sm:$0xff]  ;;  %v422_v56 = vld [vmem:[%s3920_s28 + $0x298] sm:$0xff]  ;;  %v2946_v59 = vpack.c.bf16 %v404_v51, %v403_v50 }
  0xac   : > { %2903 = vmatpush3.bf16.msra.mxu0 %v2902_v17  ;;  %v453_v57 = vld [vmem:[%s3920_s28 + $0x390] sm:$0xff]  ;;  %v454_v58 = vld [vmem:[%s3920_s28 + $0x398] sm:$0xff]  ;;  %v2978_v60 = vpack.c.bf16 %v436_v54, %v435_v52  ;;  %v2948_v61 = vpack.c.bf16 %v422_v56, %v421_v55  ;;  %v423_v3 = vld [vmem:[%s3920_s28 + $0x2a0] sm:$0xff] }
  0xad   : > { %2935 = vmatpush3.bf16.msra.mxu1 %v2934_v19  ;;  %2905 = vmatprep.subr.bf16.mxu0 %v2904_v20  ;;  %v405_v62 = vld [vmem:[%s3920_s28 + $0x210] sm:$0xff]  ;;  %v406_v63 = vld [vmem:[%s3920_s28 + $0x218] sm:$0xff]  ;;  %v2980_v1 = vpack.c.bf16 %v454_v58, %v453_v57  ;;  %v424_v4 = vld [vmem:[%s3920_s28 + $0x2a8] sm:$0xff] }
  0xae   : > { %2937 = vmatprep.subr.bf16.mxu1 %v2936_v24  ;;  %1161 = vmatprep.mubr.f32.mxu1 %v875_v42  ;;  %v437_v0 = vld [vmem:[%s3920_s28 + $0x310] sm:$0xff]  ;;  %v438_v2 = vld [vmem:[%s3920_s28 + $0x318] sm:$0xff]  ;;  %v455_v5 = vld [vmem:[%s3920_s28 + $0x3a0] sm:$0xff]  ;;  %v2950_v7 = vpack.c.bf16 %v406_v63, %v405_v62  ;;  %v2952_v9 = vpack.c.bf16 %v424_v4, %v423_v3 }
  0xaf   : > { %v456_v6 = vld [vmem:[%s3920_s28 + $0x3a8] sm:$0xff]  ;;  %v2982_v8 = vpack.c.bf16 %v438_v2, %v437_v0  ;;  %v407_v10 = vld [vmem:[%s3920_s28 + $0x220] sm:$0xff]  ;;  %v425_v16 = vld [vmem:[%s3920_s28 + $0x2b0] sm:$0xff] }
  0xb0   : > { %2907 = vmatpush3.bf16.msra.mxu0 %v2906_v32  ;;  %v408_v11 = vld [vmem:[%s3920_s28 + $0x228] sm:$0xff]  ;;  %v439_v12 = vld [vmem:[%s3920_s28 + $0x320] sm:$0xff]  ;;  %v2984_v13 = vpack.c.bf16 %v456_v6, %v455_v5  ;;  %v426_v17 = vld [vmem:[%s3920_s28 + $0x2b8] sm:$0xff] }
  0xb1   : > { %2939 = vmatpush3.bf16.msra.mxu1 %v2938_v35  ;;  %2909 = vmatprep.subr.bf16.mxu0 %v2908_v36  ;;  %v440_v15 = vld [vmem:[%s3920_s28 + $0x328] sm:$0xff]  ;;  %v457_v18 = vld [vmem:[%s3920_s28 + $0x3b0] sm:$0xff]  ;;  %v458_v19 = vld [vmem:[%s3920_s28 + $0x3b8] sm:$0xff]  ;;  %v2954_v20 = vpack.c.bf16 %v408_v11, %v407_v10  ;;  %v2956_v22 = vpack.c.bf16 %v426_v17, %v425_v16 }
  0xb2   : > { %2941 = vmatprep.subr.bf16.mxu1 %v2940_v40  ;;  %v2986_v21 = vpack.c.bf16 %v440_v15, %v439_v12  ;;  %v409_v23 = vld [vmem:[%s3920_s28 + $0x230] sm:$0xff]  ;;  %v410_v24 = vld [vmem:[%s3920_s28 + $0x238] sm:$0xff]  ;;  %v2988_v26 = vpack.c.bf16 %v458_v19, %v457_v18  ;;  %v428_v29 = vld [vmem:[%s3920_s28 + $0x2c8] sm:$0xff] }
  0xb3   : > { %v441_v25 = vld [vmem:[%s3920_s28 + $0x330] sm:$0xff]  ;;  %v442_v27 = vld [vmem:[%s3920_s28 + $0x338] sm:$0xff]  ;;  %v459_v30 = vld [vmem:[%s3920_s28 + $0x3c0] sm:$0xff]  ;;  %v2958_v33 = vpack.c.bf16 %v410_v24, %v409_v23 }
  0xb4   : > { %2911 = vmatpush3.bf16.msra.mxu0 %v2910_v47  ;;  %v460_v31 = vld [vmem:[%s3920_s28 + $0x3c8] sm:$0xff]  ;;  %v2990_v36 = vpack.c.bf16 %v442_v27, %v441_v25  ;;  %v411_v38 = vld [vmem:[%s3920_s28 + $0x240] sm:$0xff]  ;;  %v429_v43 = vld [vmem:[%s3920_s28 + $0x2d0] sm:$0xff] }
  0xb5   : > { %2943 = vmatpush3.bf16.msra.mxu1 %v2942_v48  ;;  %2945 = vmatprep.subr.bf16.mxu0 %v2944_v49  ;;  %v332_v32 = vld [vmem:[%s3912_s30 + $0x8] sm:$0xff]  ;;  %v443_v40 = vld [vmem:[%s3920_s28 + $0x340] sm:$0xff]  ;;  %v2992_v41 = vpack.c.bf16 %v460_v31, %v459_v30  ;;  %v430_v44 = vld [vmem:[%s3920_s28 + $0x2d8] sm:$0xff] }
  0xb6   : > { %2977 = vmatprep.subr.bf16.mxu1 %v2976_v53  ;;  %v876_v35 = vcombine.high %v332_v32, %v332_v32  ;;  %v412_v39 = vld [vmem:[%s3920_s28 + $0x248] sm:$0xff]  ;;  %v461_v47 = vld [vmem:[%s3920_s28 + $0x3d0] sm:$0xff]  ;;  %v462_v48 = vld [vmem:[%s3920_s28 + $0x3d8] sm:$0xff]  ;;  %v2964_v52 = vpack.c.bf16 %v430_v44, %v429_v43 }
  0xb7   : > { %1092 = vmatmul.mubr.f32.vlgmr.msra.gmra.mrb[0].mxu0 %v866_v28  ;;  %v427_v28 = vld [vmem:[%s3920_s28 + $0x2c0] sm:$0xff]  ;;  %v444_v42 = vld [vmem:[%s3920_s28 + $0x348] sm:$0xff]  ;;  %v2962_v49 = vpack.c.bf16 %v412_v39, %v411_v38  ;;  %v413_v53 = vld [vmem:[%s3920_s28 + $0x250] sm:$0xff]  ;;  %v2996_v56 = vpack.c.bf16 %v462_v48, %v461_v47 }
  0xb8   : > { %1162 = vmatmul.mubr.f32.vlgmr.msra.gmra.mrb[0].mxu1 %v873_v34  ;;  %2947 = vmatpush3.bf16.msra.mxu0 %v2946_v59  ;;  %v4042_v34 = vrot.slane %v332_v32, %v3985_v14  ;;  %v2960_v37 = vpack.c.bf16 %v428_v29, %v427_v28  ;;  %v4053_v46 = vrot.slane %v876_v35, %v3985_v14  ;;  %v414_v54 = vld [vmem:[%s3920_s28 + $0x258] sm:$0xff]  ;;  %v445_v55 = vld [vmem:[%s3920_s28 + $0x350] sm:$0xff]  ;;  %v431_v58 = vld [vmem:[%s3920_s28 + $0x2e0] sm:$0xff] }
  0xb9   : > { %2979 = vmatpush3.bf16.msra.mxu1 %v2978_v60  ;;  %2949 = vmatprep.subr.bf16.mxu0 %v2948_v61  ;;  %v2994_v51 = vpack.c.bf16 %v444_v42, %v443_v40  ;;  %v446_v57 = vld [vmem:[%s3920_s28 + $0x358] sm:$0xff]  ;;  %v432_v59 = vld [vmem:[%s3920_s28 + $0x2e8] sm:$0xff]  ;;  %v463_v60 = vld [vmem:[%s3920_s28 + $0x3e0] sm:$0xff]  ;;  %v2966_v62 = vpack.c.bf16 %v414_v54, %v413_v53 }
  0xba   : > { %2981 = vmatprep.subr.bf16.mxu1 %v2980_v1  ;;  %v891_v45 = vcombine.high %v4042_v34, %v4042_v34  ;;  %v892_v50 = vcombine.high %v4053_v46, %v4053_v46  ;;  %v464_v61 = vld [vmem:[%s3920_s28 + $0x3e8] sm:$0xff]  ;;  %v2998_v63 = vpack.c.bf16 %v446_v57, %v445_v55  ;;  %v2968_v0 = vpack.c.bf16 %v432_v59, %v431_v58  ;;  %v415_v1 = vld [vmem:[%s3920_s28 + $0x260] sm:$0xff]  ;;  %v433_v6 = vld [vmem:[%s3920_s28 + $0x2f0] sm:$0xff] }
  0xbb   : > { %v416_v2 = vld [vmem:[%s3920_s28 + $0x268] sm:$0xff]  ;;  %v447_v3 = vld [vmem:[%s3920_s28 + $0x360] sm:$0xff]  ;;  %v3000_v4 = vpack.c.bf16 %v464_v61, %v463_v60  ;;  %v418_v15 = vld [vmem:[%s3920_s28 + $0x278] sm:$0xff] }
  0xbc   : > { %2951 = vmatpush3.bf16.msra.mxu0 %v2950_v7  ;;  %1231 = vmatprep.mubr.f32.mxu0 %v891_v45  ;;  %v448_v5 = vld [vmem:[%s3920_s28 + $0x368] sm:$0xff]  ;;  %v434_v7 = vld [vmem:[%s3920_s28 + $0x2f8] sm:$0xff]  ;;  %v2970_v10 = vpack.c.bf16 %v416_v2, %v415_v1  ;;  %v449_v16 = vld [vmem:[%s3920_s28 + $0x370] sm:$0xff] }
  0xbd   : > { %2983 = vmatpush3.bf16.msra.mxu1 %v2982_v8  ;;  %2953 = vmatprep.subr.bf16.mxu0 %v2952_v9  ;;  %v465_v8 = vld [vmem:[%s3920_s28 + $0x3f0] sm:$0xff]  ;;  %v466_v9 = vld [vmem:[%s3920_s28 + $0x3f8] sm:$0xff]  ;;  %v3002_v11 = vpack.c.bf16 %v448_v5, %v447_v3  ;;  %v2972_v12 = vpack.c.bf16 %v434_v7, %v433_v6  ;;  %v483_v19 = vld [vmem:[%s3920_s28 + $0x480] sm:$0xff] }
  0xbe   : > { %2985 = vmatprep.subr.bf16.mxu1 %v2984_v13  ;;  %1301 = vmatprep.mubr.f32.mxu1 %v892_v50  ;;  %v417_v13 = vld [vmem:[%s3920_s28 + $0x270] sm:$0xff]  ;;  %v3004_v17 = vpack.c.bf16 %v466_v9, %v465_v8  ;;  %v450_v18 = vld [vmem:[%s3920_s28 + $0x378] sm:$0xff]  ;;  %v467_v24 = vld [vmem:[%s3920_s28 + $0x400] sm:$0xff] }
  0xbf   : > { %v2974_v23 = vpack.c.bf16 %v418_v15, %v417_v13  ;;  %v3006_v25 = vpack.c.bf16 %v450_v18, %v449_v16  ;;  %v468_v27 = vld [vmem:[%s3920_s28 + $0x408] sm:$0xff]  ;;  %v499_v28 = vld [vmem:[%s3920_s28 + $0x500] sm:$0xff]  ;;  %v485_v31 = vld [vmem:[%s3920_s28 + $0x490] sm:$0xff] }
  0xc0   : > { %2955 = vmatpush3.bf16.msra.mxu0 %v2954_v20  ;;  %v484_v20 = vld [vmem:[%s3920_s28 + $0x488] sm:$0xff]  ;;  %v486_v32 = vld [vmem:[%s3920_s28 + $0x498] sm:$0xff]  ;;  %v333_v38 = vld [vmem:[%s3912_s30 + $0x10] sm:$0xff] }
  0xc1   : > { %2987 = vmatpush3.bf16.msra.mxu1 %v2986_v21  ;;  %2957 = vmatprep.subr.bf16.mxu0 %v2956_v22  ;;  %v515_v21 = vld [vmem:[%s3920_s28 + $0x580] sm:$0xff]  ;;  %v516_v22 = vld [vmem:[%s3920_s28 + $0x588] sm:$0xff]  ;;  %v518_v35 = vld [vmem:[%s3920_s28 + $0x598] sm:$0xff]  ;;  %v3012_v39 = vpack.c.bf16 %v486_v32, %v485_v31  ;;  %v4096_v43 = vrot.slane %v333_v38, %v3985_v14  ;;  %v893_v44 = vcombine.high %v333_v38, %v333_v38 }
  0xc2   : > { %2989 = vmatprep.subr.bf16.mxu1 %v2988_v26  ;;  %v3008_v26 = vpack.c.bf16 %v484_v20, %v483_v19  ;;  %v500_v29 = vld [vmem:[%s3920_s28 + $0x508] sm:$0xff]  ;;  %v3040_v30 = vpack.c.bf16 %v516_v22, %v515_v21  ;;  %v469_v40 = vld [vmem:[%s3920_s28 + $0x410] sm:$0xff]  ;;  %v502_v47 = vld [vmem:[%s3920_s28 + $0x518] sm:$0xff] }
  0xc3   : > { %v501_v42 = vld [vmem:[%s3920_s28 + $0x510] sm:$0xff]  ;;  %v487_v48 = vld [vmem:[%s3920_s28 + $0x4a0] sm:$0xff]  ;;  %v4107_v53 = vrot.slane %v893_v44, %v3985_v14  ;;  %v472_v57 = vld [vmem:[%s3920_s28 + $0x428] sm:$0xff] }
  0xc4   : > { %2959 = vmatpush3.bf16.msra.mxu0 %v2958_v33  ;;  %v517_v33 = vld [vmem:[%s3920_s28 + $0x590] sm:$0xff]  ;;  %v519_v50 = vld [vmem:[%s3920_s28 + $0x5a0] sm:$0xff]  ;;  %v504_v61 = vld [vmem:[%s3920_s28 + $0x528] sm:$0xff] }
  0xc5   : > { %2991 = vmatpush3.bf16.msra.mxu1 %v2990_v36  ;;  %2961 = vmatprep.subr.bf16.mxu0 %v2960_v37  ;;  %v3010_v36 = vpack.c.bf16 %v468_v27, %v467_v24  ;;  %v3042_v37 = vpack.c.bf16 %v500_v29, %v499_v28  ;;  %v3044_v45 = vpack.c.bf16 %v518_v35, %v517_v33  ;;  %v503_v58 = vld [vmem:[%s3920_s28 + $0x520] sm:$0xff]  ;;  %v474_v5 = vld [vmem:[%s3920_s28 + $0x438] sm:$0xff]  ;;  %v505_v6 = vld [vmem:[%s3920_s28 + $0x530] sm:$0xff] }
  0xc6   : > { %2993 = vmatprep.subr.bf16.mxu1 %v2992_v41  ;;  %v470_v41 = vld [vmem:[%s3920_s28 + $0x418] sm:$0xff]  ;;  %v909_v59 = vcombine.high %v4107_v53, %v4107_v53  ;;  %v3050_v2 = vpack.c.bf16 %v504_v61, %v503_v58  ;;  %v491_v9 = vld [vmem:[%s3920_s28 + $0x4c0] sm:$0xff]  ;;  %v476_v18 = vld [vmem:[%s3920_s28 + $0x448] sm:$0xff] }
  0xc7   : > { %v3014_v54 = vpack.c.bf16 %v470_v41, %v469_v40  ;;  %v506_v8 = vld [vmem:[%s3920_s28 + $0x538] sm:$0xff]  ;;  %v507_v19 = vld [vmem:[%s3920_s28 + $0x540] sm:$0xff]  ;;  %v508_v21 = vld [vmem:[%s3920_s28 + $0x548] sm:$0xff] }
  0xc8   : > { %2963 = vmatpush3.bf16.msra.mxu0 %v2962_v49  ;;  %v488_v49 = vld [vmem:[%s3920_s28 + $0x4a8] sm:$0xff]  ;;  %v3054_v15 = vpack.c.bf16 %v506_v8, %v505_v6  ;;  %v493_v22 = vld [vmem:[%s3920_s28 + $0x4d0] sm:$0xff]  ;;  %v3058_v27 = vpack.c.bf16 %v508_v21, %v507_v19  ;;  %v510_v33 = vld [vmem:[%s3920_s28 + $0x558] sm:$0xff] }
  0xc9   : > { %2995 = vmatpush3.bf16.msra.mxu1 %v2994_v51  ;;  %2965 = vmatprep.subr.bf16.mxu0 %v2964_v52  ;;  %v520_v51 = vld [vmem:[%s3920_s28 + $0x5a8] sm:$0xff]  ;;  %v908_v52 = vcombine.high %v4096_v43, %v4096_v43  ;;  %v3016_v55 = vpack.c.bf16 %v488_v49, %v487_v48  ;;  %v525_v24 = vld [vmem:[%s3920_s28 + $0x5d0] sm:$0xff]  ;;  %v495_v35 = vld [vmem:[%s3920_s28 + $0x4e0] sm:$0xff] }
  0xca   : > { %2997 = vmatprep.subr.bf16.mxu1 %v2996_v56  ;;  %v471_v56 = vld [vmem:[%s3920_s28 + $0x420] sm:$0xff]  ;;  %v3048_v60 = vpack.c.bf16 %v520_v51, %v519_v50  ;;  %v477_v29 = vld [vmem:[%s3920_s28 + $0x450] sm:$0xff]  ;;  %v528_v38 = vld [vmem:[%s3920_s28 + $0x5e8] sm:$0xff] }
  0xcb   : > { %v3018_v1 = vpack.c.bf16 %v472_v57, %v471_v56  ;;  %v509_v31 = vld [vmem:[%s3920_s28 + $0x550] sm:$0xff]  ;;  %v480_v44 = vld [vmem:[%s3920_s28 + $0x468] sm:$0xff]  ;;  %v498_v50 = vld [vmem:[%s3920_s28 + $0x4f8] sm:$0xff] }
  0xcc   : > { %2967 = vmatpush3.bf16.msra.mxu0 %v2966_v62  ;;  %v490_v62 = vld [vmem:[%s3920_s28 + $0x4b8] sm:$0xff]  ;;  %v3062_v40 = vpack.c.bf16 %v510_v33, %v509_v31  ;;  %v512_v48 = vld [vmem:[%s3920_s28 + $0x568] sm:$0xff]  ;;  %v497_v49 = vld [vmem:[%s3920_s28 + $0x4f0] sm:$0xff] }
  0xcd   : > { %2999 = vmatpush3.bf16.msra.mxu1 %v2998_v63  ;;  %2969 = vmatprep.subr.bf16.mxu0 %v2968_v0  ;;  %v521_v63 = vld [vmem:[%s3920_s28 + $0x5b0] sm:$0xff]  ;;  %v522_v0 = vld [vmem:[%s3920_s28 + $0x5b8] sm:$0xff]  ;;  %v3036_v56 = vpack.c.bf16 %v498_v50, %v497_v49  ;;  %v532_v6 = vld [vmem:[%s3920_s28 + $0x608] sm:$0xff] }
  0xce   : > { %3001 = vmatprep.subr.bf16.mxu1 %v3000_v4  ;;  %v473_v4 = vld [vmem:[%s3920_s28 + $0x430] sm:$0xff]  ;;  %v3052_v7 = vpack.c.bf16 %v522_v0, %v521_v63  ;;  %v482_v58 = vld [vmem:[%s3920_s28 + $0x478] sm:$0xff]  ;;  %v579_v63 = vld [vmem:[%s3920_s28 + $0x780] sm:$0xff] }
  0xcf   : > { %v3022_v13 = vpack.c.bf16 %v474_v5, %v473_v4  ;;  %v529_v51 = vld [vmem:[%s3920_s28 + $0x5f0] sm:$0xff]  ;;  %v514_v61 = vld [vmem:[%s3920_s28 + $0x578] sm:$0xff]  ;;  %v580_v0 = vld [vmem:[%s3920_s28 + $0x788] sm:$0xff] }
  0xd0   : > { %2971 = vmatpush3.bf16.msra.mxu0 %v2970_v10  ;;  %v492_v10 = vld [vmem:[%s3920_s28 + $0x4c8] sm:$0xff]  ;;  %v481_v57 = vld [vmem:[%s3920_s28 + $0x470] sm:$0xff]  ;;  %v531_v5 = vld [vmem:[%s3920_s28 + $0x600] sm:$0xff]  ;;  %v3104_v8 = vpack.c.bf16 %v580_v0, %v579_v63 }
  0xd1   : > { %3003 = vmatpush3.bf16.msra.mxu1 %v3002_v11  ;;  %2973 = vmatprep.subr.bf16.mxu0 %v2972_v12  ;;  %v523_v11 = vld [vmem:[%s3920_s28 + $0x5c0] sm:$0xff]  ;;  %v524_v12 = vld [vmem:[%s3920_s28 + $0x5c8] sm:$0xff]  ;;  %v3024_v16 = vpack.c.bf16 %v492_v10, %v491_v9  ;;  %v549_v10 = vld [vmem:[%s3920_s28 + $0x690] sm:$0xff] }
  0xd2   : > { %3005 = vmatprep.subr.bf16.mxu1 %v3004_v17  ;;  %v475_v17 = vld [vmem:[%s3920_s28 + $0x440] sm:$0xff]  ;;  %v3056_v20 = vpack.c.bf16 %v524_v12, %v523_v11  ;;  %v564_v9 = vld [vmem:[%s3920_s28 + $0x708] sm:$0xff]  ;;  %v550_v11 = vld [vmem:[%s3920_s28 + $0x698] sm:$0xff] }
  0xd3   : > { %v3076_v19 = vpack.c.bf16 %v550_v11, %v549_v10  ;;  %v534_v21 = vld [vmem:[%s3920_s28 + $0x618] sm:$0xff]  ;;  %v569_v49 = vld [vmem:[%s3920_s28 + $0x730] sm:$0xff]  ;;  %v559_v11 = vld [vmem:[%s3920_s28 + $0x6e0] sm:$0xff] }
  0xd4   : > { %2975 = vmatpush3.bf16.msra.mxu0 %v2974_v23  ;;  %v494_v23 = vld [vmem:[%s3920_s28 + $0x4d8] sm:$0xff]  ;;  %v557_v63 = vld [vmem:[%s3920_s28 + $0x6d0] sm:$0xff] }
  0xd5   : > { %3007 = vmatpush3.bf16.msra.mxu1 %v3006_v25  ;;  %3009 = vmatprep.subr.bf16.mxu0 %v3008_v26  ;;  %v526_v25 = vld [vmem:[%s3920_s28 + $0x5d8] sm:$0xff]  ;;  %v3026_v26 = vpack.c.bf16 %v476_v18, %v475_v17  ;;  %v3028_v28 = vpack.c.bf16 %v494_v23, %v493_v22  ;;  %v3074_v17 = vpack.c.bf16 %v532_v6, %v531_v5  ;;  %v565_v22 = vld [vmem:[%s3920_s28 + $0x710] sm:$0xff] }
  0xd6   : > { %3041 = vmatprep.subr.bf16.mxu1 %v3040_v30  ;;  %v478_v30 = vld [vmem:[%s3920_s28 + $0x458] sm:$0xff]  ;;  %v3060_v32 = vpack.c.bf16 %v526_v25, %v525_v24  ;;  %v551_v25 = vld [vmem:[%s3920_s28 + $0x6a0] sm:$0xff]  ;;  %v541_v6 = vld [vmem:[%s3920_s28 + $0x650] sm:$0xff] }
  0xd7   : > { %1232 = vmatmul.mubr.f32.vlgmr.msra.gmra.mrb[2].mxu0 %v4042_v34  ;;  %v3046_v34 = vpack.c.bf16 %v502_v47, %v501_v42  ;;  %v479_v42 = vld [vmem:[%s3920_s28 + $0x460] sm:$0xff]  ;;  %v566_v24 = vld [vmem:[%s3920_s28 + $0x718] sm:$0xff] }
  0xd8   : > { %3011 = vmatpush3.bf16.msra.mxu0 %v3010_v36  ;;  %1302 = vmatmul.mubr.f32.vlgmr.msra.gmra.mrb[2].mxu1 %v4053_v46  ;;  %v489_v46 = vld [vmem:[%s3920_s28 + $0x4b0] sm:$0xff]  ;;  %v496_v36 = vld [vmem:[%s3920_s28 + $0x4e8] sm:$0xff]  ;;  %v558_v0 = vld [vmem:[%s3920_s28 + $0x6d8] sm:$0xff] }
  0xd9   : > { %3043 = vmatpush3.bf16.msra.mxu1 %v3042_v37  ;;  %3013 = vmatprep.subr.bf16.mxu0 %v3012_v39  ;;  %v3020_v3 = vpack.c.bf16 %v490_v62, %v489_v46  ;;  %v527_v37 = vld [vmem:[%s3920_s28 + $0x5e0] sm:$0xff]  ;;  %v3030_v39 = vpack.c.bf16 %v478_v30, %v477_v29  ;;  %v3032_v41 = vpack.c.bf16 %v496_v36, %v495_v35  ;;  %v548_v62 = vld [vmem:[%s3920_s28 + $0x688] sm:$0xff]  ;;  %v574_v10 = vld [vmem:[%s3920_s28 + $0x758] sm:$0xff] }
  0xda   : > { %3045 = vmatprep.subr.bf16.mxu1 %v3044_v45  ;;  %1371 = vmatprep.mubr.f32.mxu0 %v908_v52  ;;  %v511_v45 = vld [vmem:[%s3920_s28 + $0x560] sm:$0xff]  ;;  %v3064_v47 = vpack.c.bf16 %v528_v38, %v527_v37  ;;  %v530_v52 = vld [vmem:[%s3920_s28 + $0x5f8] sm:$0xff]  ;;  %v584_v29 = vld [vmem:[%s3920_s28 + $0x7a8] sm:$0xff]  ;;  %v3092_v5 = vpack.c.bf16 %v558_v0, %v557_v63 }
  0xdb   : > { %1441 = vmatprep.mubr.f32.mxu1 %v909_v59  ;;  %v513_v59 = vld [vmem:[%s3920_s28 + $0x570] sm:$0xff]  ;;  %v547_v46 = vld [vmem:[%s3920_s28 + $0x680] sm:$0xff]  ;;  %v568_v38 = vld [vmem:[%s3920_s28 + $0x728] sm:$0xff] }
  0xdc   : > { %3015 = vmatpush3.bf16.msra.mxu0 %v3014_v54  ;;  %v3034_v54 = vpack.c.bf16 %v480_v44, %v479_v42  ;;  %v3072_v4 = vpack.c.bf16 %v548_v62, %v547_v46  ;;  %v535_v35 = vld [vmem:[%s3920_s28 + $0x620] sm:$0xff]  ;;  %v572_v62 = vld [vmem:[%s3920_s28 + $0x748] sm:$0xff]  ;;  %v629_v63 = vld [vmem:[%s3920_s28 + $0x910] sm:$0xff] }
  0xdd   : > { %3047 = vmatpush3.bf16.msra.mxu1 %v3046_v34  ;;  %3017 = vmatprep.subr.bf16.mxu0 %v3016_v55  ;;  %v334_v34 = vld [vmem:[%s3912_s30 + $0x18] sm:$0xff]  ;;  %v3066_v55 = vpack.c.bf16 %v512_v48, %v511_v45  ;;  %v567_v36 = vld [vmem:[%s3920_s28 + $0x720] sm:$0xff] }
  0xde   : > { %3049 = vmatprep.subr.bf16.mxu1 %v3048_v60  ;;  %v3068_v60 = vpack.c.bf16 %v530_v52, %v529_v51  ;;  %v4168_v12 = vrot.slane %v334_v34, %v3985_v14  ;;  %v3114_v44 = vpack.c.bf16 %v568_v38, %v567_v36  ;;  %v538_v48 = vld [vmem:[%s3920_s28 + $0x638] sm:$0xff]  ;;  %v555_v52 = vld [vmem:[%s3920_s28 + $0x6c0] sm:$0xff]  ;;  %v577_v36 = vld [vmem:[%s3920_s28 + $0x770] sm:$0xff] }
  0xdf   : > { %v570_v51 = vld [vmem:[%s3920_s28 + $0x738] sm:$0xff] }
  0xe0   : > { %3019 = vmatpush3.bf16.msra.mxu0 %v3018_v1  ;;  %v910_v1 = vcombine.high %v334_v34, %v334_v34  ;;  %v587_v34 = vld [vmem:[%s3920_s28 + $0x7c0] sm:$0xff]  ;;  %v578_v38 = vld [vmem:[%s3920_s28 + $0x778] sm:$0xff] }
  0xe1   : > { %3051 = vmatpush3.bf16.msra.mxu1 %v3050_v2  ;;  %3021 = vmatprep.subr.bf16.mxu0 %v3020_v3  ;;  %v3038_v2 = vpack.c.bf16 %v482_v58, %v481_v57  ;;  %v3070_v3 = vpack.c.bf16 %v514_v61, %v513_v59  ;;  %v3118_v57 = vpack.c.bf16 %v570_v51, %v569_v49  ;;  %v539_v59 = vld [vmem:[%s3920_s28 + $0x640] sm:$0xff]  ;;  %v596_v49 = vld [vmem:[%s3920_s28 + $0x808] sm:$0xff] }
  0xe2   : > { %3053 = vmatprep.subr.bf16.mxu1 %v3052_v7  ;;  %v563_v7 = vld [vmem:[%s3920_s28 + $0x700] sm:$0xff] }
  0xe3   : > { %v3106_v18 = vpack.c.bf16 %v564_v9, %v563_v7  ;;  %v571_v61 = vld [vmem:[%s3920_s28 + $0x740] sm:$0xff]  ;;  %v542_v7 = vld [vmem:[%s3920_s28 + $0x658] sm:$0xff] }
  0xe4   : > { %3023 = vmatpush3.bf16.msra.mxu0 %v3022_v13  ;;  %v581_v13 = vld [vmem:[%s3920_s28 + $0x790] sm:$0xff] }
  0xe5   : > { %3055 = vmatpush3.bf16.msra.mxu1 %v3054_v15  ;;  %3025 = vmatprep.subr.bf16.mxu0 %v3024_v16  ;;  %v582_v15 = vld [vmem:[%s3920_s28 + $0x798] sm:$0xff]  ;;  %v4173_v16 = vrot.slane %v910_v1, %v3985_v14  ;;  %v589_v1 = vld [vmem:[%s3920_s28 + $0x7d0] sm:$0xff] }
  0xe6   : > { %3057 = vmatprep.subr.bf16.mxu1 %v3056_v20  ;;  %v533_v20 = vld [vmem:[%s3920_s28 + $0x610] sm:$0xff]  ;;  %v3108_v23 = vpack.c.bf16 %v582_v15, %v581_v13  ;;  %v560_v13 = vld [vmem:[%s3920_s28 + $0x6e8] sm:$0xff]  ;;  %v591_v15 = vld [vmem:[%s3920_s28 + $0x7e0] sm:$0xff] }
  0xe7   : > { %v926_v30 = vcombine.high %v4173_v16, %v4173_v16  ;;  %v3078_v31 = vpack.c.bf16 %v534_v21, %v533_v20  ;;  %v3096_v20 = vpack.c.bf16 %v560_v13, %v559_v11  ;;  %v543_v21 = vld [vmem:[%s3920_s28 + $0x660] sm:$0xff] }
  0xe8   : > { %3027 = vmatpush3.bf16.msra.mxu0 %v3026_v26  ;;  %v552_v26 = vld [vmem:[%s3920_s28 + $0x6a8] sm:$0xff]  ;;  %v599_v11 = vld [vmem:[%s3920_s28 + $0x820] sm:$0xff] }
  0xe9   : > { %3059 = vmatpush3.bf16.msra.mxu1 %v3058_v27  ;;  %3029 = vmatprep.subr.bf16.mxu0 %v3028_v28  ;;  %v925_v27 = vcombine.high %v4168_v12, %v4168_v12  ;;  %v583_v28 = vld [vmem:[%s3920_s28 + $0x7a0] sm:$0xff]  ;;  %v3080_v33 = vpack.c.bf16 %v552_v26, %v551_v25  ;;  %v576_v25 = vld [vmem:[%s3920_s28 + $0x768] sm:$0xff]  ;;  %v561_v26 = vld [vmem:[%s3920_s28 + $0x6f0] sm:$0xff] }
  0xea   : > { %3061 = vmatprep.subr.bf16.mxu1 %v3060_v32  ;;  %v3110_v32 = vpack.c.bf16 %v566_v24, %v565_v22  ;;  %v3112_v37 = vpack.c.bf16 %v584_v29, %v583_v28  ;;  %v544_v22 = vld [vmem:[%s3920_s28 + $0x668] sm:$0xff]  ;;  %v593_v28 = vld [vmem:[%s3920_s28 + $0x7f0] sm:$0xff]  ;;  %v594_v29 = vld [vmem:[%s3920_s28 + $0x7f8] sm:$0xff] }
  0xeb   : > { %v631_v13 = vld [vmem:[%s3920_s28 + $0x920] sm:$0xff] }
  0xec   : > { %3031 = vmatpush3.bf16.msra.mxu0 %v3030_v39  ;;  %v553_v39 = vld [vmem:[%s3920_s28 + $0x6b0] sm:$0xff] }
  0xed   : > { %3063 = vmatpush3.bf16.msra.mxu1 %v3062_v40  ;;  %3033 = vmatprep.subr.bf16.mxu0 %v3032_v41  ;;  %v554_v40 = vld [vmem:[%s3920_s28 + $0x6b8] sm:$0xff] }
  0xee   : > { %3065 = vmatprep.subr.bf16.mxu1 %v3064_v47  ;;  %v586_v41 = vld [vmem:[%s3920_s28 + $0x7b8] sm:$0xff]  ;;  %v3084_v45 = vpack.c.bf16 %v554_v40, %v553_v39  ;;  %v537_v47 = vld [vmem:[%s3920_s28 + $0x630] sm:$0xff]  ;;  %v611_v39 = vld [vmem:[%s3920_s28 + $0x880] sm:$0xff] }
  0xef   : > { %v612_v40 = vld [vmem:[%s3920_s28 + $0x888] sm:$0xff] }
  0xf0   : > { %3035 = vmatpush3.bf16.msra.mxu0 %v3034_v54  ;;  %v556_v54 = vld [vmem:[%s3920_s28 + $0x6c8] sm:$0xff] }
  0xf1   : > { %3067 = vmatpush3.bf16.msra.mxu1 %v3066_v55  ;;  %3037 = vmatprep.subr.bf16.mxu0 %v3036_v56  ;;  %v588_v55 = vld [vmem:[%s3920_s28 + $0x7c8] sm:$0xff]  ;;  %v3086_v56 = vpack.c.bf16 %v538_v48, %v537_v47  ;;  %v3088_v58 = vpack.c.bf16 %v556_v54, %v555_v52  ;;  %v3136_v47 = vpack.c.bf16 %v612_v40, %v611_v39  ;;  %v595_v48 = vld [vmem:[%s3920_s28 + $0x800] sm:$0xff]  ;;  %v613_v54 = vld [vmem:[%s3920_s28 + $0x890] sm:$0xff] }
  0xf2   : > { %3069 = vmatprep.subr.bf16.mxu1 %v3068_v60  ;;  %v540_v60 = vld [vmem:[%s3920_s28 + $0x648] sm:$0xff]  ;;  %v3120_v46 = vpack.c.bf16 %v588_v55, %v587_v34  ;;  %v614_v34 = vld [vmem:[%s3920_s28 + $0x898] sm:$0xff] }
  0xf3   : > { %v628_v52 = vld [vmem:[%s3920_s28 + $0x908] sm:$0xff] }
  0xf4   : > { %3039 = vmatpush3.bf16.msra.mxu0 %v3038_v2  ;;  %v590_v2 = vld [vmem:[%s3920_s28 + $0x7d8] sm:$0xff]  ;;  %v636_v40 = vld [vmem:[%s3920_s28 + $0x948] sm:$0xff] }
  0xf5   : > { %3071 = vmatpush3.bf16.msra.mxu1 %v3070_v3  ;;  %3073 = vmatprep.subr.bf16.mxu0 %v3072_v4  ;;  %v3090_v3 = vpack.c.bf16 %v540_v60, %v539_v59  ;;  %v3122_v4 = vpack.c.bf16 %v572_v62, %v571_v61  ;;  %v3124_v9 = vpack.c.bf16 %v590_v2, %v589_v1  ;;  %v598_v62 = vld [vmem:[%s3920_s28 + $0x818] sm:$0xff]  ;;  %v615_v2 = vld [vmem:[%s3920_s28 + $0x8a0] sm:$0xff] }
  0xf6   : > { %3105 = vmatprep.subr.bf16.mxu1 %v3104_v8  ;;  %v573_v8 = vld [vmem:[%s3920_s28 + $0x750] sm:$0xff]  ;;  %v3138_v59 = vpack.c.bf16 %v596_v49, %v595_v48  ;;  %v3140_v61 = vpack.c.bf16 %v614_v34, %v613_v54  ;;  %v630_v1 = vld [vmem:[%s3920_s28 + $0x918] sm:$0xff]  ;;  %v623_v34 = vld [vmem:[%s3920_s28 + $0x8e0] sm:$0xff] }
  0xf7   : > { %1372 = vmatmul.mubr.f32.vlgmr.msra.gmra.mrb[4].mxu0 %v4096_v43  ;;  %v536_v43 = vld [vmem:[%s3920_s28 + $0x628] sm:$0xff]  ;;  %v605_v49 = vld [vmem:[%s3920_s28 + $0x850] sm:$0xff]  ;;  %v638_v54 = vld [vmem:[%s3920_s28 + $0x958] sm:$0xff] }
  0xf8   : > { %3075 = vmatpush3.bf16.msra.mxu0 %v3074_v17  ;;  %1442 = vmatmul.mubr.f32.vlgmr.msra.gmra.mrb[4].mxu1 %v4107_v53  ;;  %v585_v53 = vld [vmem:[%s3920_s28 + $0x7b0] sm:$0xff]  ;;  %v3082_v42 = vpack.c.bf16 %v536_v43, %v535_v35  ;;  %v592_v17 = vld [vmem:[%s3920_s28 + $0x7e8] sm:$0xff]  ;;  %v546_v43 = vld [vmem:[%s3920_s28 + $0x678] sm:$0xff] }
  0xf9   : > { %3107 = vmatpush3.bf16.msra.mxu1 %v3106_v18  ;;  %3077 = vmatprep.subr.bf16.mxu0 %v3076_v19  ;;  %v3116_v50 = vpack.c.bf16 %v586_v41, %v585_v53  ;;  %v3094_v18 = vpack.c.bf16 %v542_v7, %v541_v6  ;;  %v3126_v19 = vpack.c.bf16 %v574_v10, %v573_v8  ;;  %v545_v35 = vld [vmem:[%s3920_s28 + $0x670] sm:$0xff]  ;;  %v643_v53 = vld [vmem:[%s3920_s28 + $0x980] sm:$0xff]  ;;  %v644_v41 = vld [vmem:[%s3920_s28 + $0x988] sm:$0xff] }
  0xfa   : > { %3109 = vmatprep.subr.bf16.mxu1 %v3108_v23  ;;  %1511 = vmatprep.mubr.f32.mxu0 %v925_v27  ;;  %v575_v23 = vld [vmem:[%s3920_s28 + $0x760] sm:$0xff]  ;;  %v3128_v24 = vpack.c.bf16 %v592_v17, %v591_v15  ;;  %v562_v27 = vld [vmem:[%s3920_s28 + $0x6f8] sm:$0xff]  ;;  %v3168_v51 = vpack.c.bf16 %v644_v41, %v643_v53  ;;  %v648_v6 = vld [vmem:[%s3920_s28 + $0x9a8] sm:$0xff] }
  0xfb   : > { %1581 = vmatprep.mubr.f32.mxu1 %v926_v30  ;;  %v3098_v30 = vpack.c.bf16 %v544_v22, %v543_v21  ;;  %v632_v17 = vld [vmem:[%s3920_s28 + $0x928] sm:$0xff]  ;;  %v621_v53 = vld [vmem:[%s3920_s28 + $0x8d0] sm:$0xff]  ;;  %v622_v41 = vld [vmem:[%s3920_s28 + $0x8d8] sm:$0xff] }
  0xfc   : > { %3079 = vmatpush3.bf16.msra.mxu0 %v3078_v31  ;;  %v335_v31 = vld [vmem:[%s3912_s30 + $0x20] sm:$0xff]  ;;  %v3178_v22 = vpack.c.bf16 %v632_v17, %v631_v13  ;;  %v3156_v48 = vpack.c.bf16 %v622_v41, %v621_v53  ;;  %v641_v13 = vld [vmem:[%s3920_s28 + $0x970] sm:$0xff]  ;;  %v642_v17 = vld [vmem:[%s3920_s28 + $0x978] sm:$0xff] }
  0xfd   : > { %3111 = vmatpush3.bf16.msra.mxu1 %v3110_v32  ;;  %3081 = vmatprep.subr.bf16.mxu0 %v3080_v33  ;;  %v3130_v32 = vpack.c.bf16 %v576_v25, %v575_v23  ;;  %v3100_v33 = vpack.c.bf16 %v562_v27, %v561_v26  ;;  %v4245_v55 = vrot.slane %v335_v31, %v3985_v14  ;;  %v602_v25 = vld [vmem:[%s3920_s28 + $0x838] sm:$0xff]  ;;  %v633_v26 = vld [vmem:[%s3920_s28 + $0x930] sm:$0xff] }
  0xfe   : > { %3113 = vmatprep.subr.bf16.mxu1 %v3112_v37  ;;  %v3132_v37 = vpack.c.bf16 %v594_v29, %v593_v28  ;;  %v634_v28 = vld [vmem:[%s3920_s28 + $0x938] sm:$0xff]  ;;  %v619_v29 = vld [vmem:[%s3920_s28 + $0x8c0] sm:$0xff]  ;;  %v693_v53 = vld [vmem:[%s3920_s28 + $0xb10] sm:$0xff] }
 0x100   : > { %3083 = vmatpush3.bf16.msra.mxu0 %v3082_v42  ;;  %v927_v42 = vcombine.high %v335_v31, %v335_v31  ;;  %v651_v31 = vld [vmem:[%s3920_s28 + $0x9c0] sm:$0xff] }
 0x101   : > { %3115 = vmatpush3.bf16.msra.mxu1 %v3114_v44  ;;  %3085 = vmatprep.subr.bf16.mxu0 %v3084_v45  ;;  %v3102_v44 = vpack.c.bf16 %v546_v43, %v545_v35  ;;  %v3134_v45 = vpack.c.bf16 %v578_v38, %v577_v36  ;;  %v3182_v35 = vpack.c.bf16 %v634_v28, %v633_v26  ;;  %v603_v36 = vld [vmem:[%s3920_s28 + $0x840] sm:$0xff]  ;;  %v660_v26 = vld [vmem:[%s3920_s28 + $0xa08] sm:$0xff] }
 0x102   : > { %3117 = vmatprep.subr.bf16.mxu1 %v3116_v50  ;;  %v627_v50 = vld [vmem:[%s3920_s28 + $0x900] sm:$0xff] }
 0x103   : > { %v3170_v60 = vpack.c.bf16 %v628_v52, %v627_v50  ;;  %v635_v38 = vld [vmem:[%s3920_s28 + $0x940] sm:$0xff]  ;;  %v606_v50 = vld [vmem:[%s3920_s28 + $0x858] sm:$0xff] }
 0x104   : > { %3087 = vmatpush3.bf16.msra.mxu0 %v3086_v56  ;;  %v645_v56 = vld [vmem:[%s3920_s28 + $0x990] sm:$0xff] }
 0x105   : > { %3119 = vmatpush3.bf16.msra.mxu1 %v3118_v57  ;;  %3089 = vmatprep.subr.bf16.mxu0 %v3088_v58  ;;  %v646_v57 = vld [vmem:[%s3920_s28 + $0x998] sm:$0xff]  ;;  %v4250_v58 = vrot.slane %v927_v42, %v3985_v14  ;;  %v653_v42 = vld [vmem:[%s3920_s28 + $0x9d0] sm:$0xff] }
 0x106   : > { %3121 = vmatprep.subr.bf16.mxu1 %v3120_v46  ;;  %v597_v46 = vld [vmem:[%s3920_s28 + $0x810] sm:$0xff]  ;;  %v3172_v0 = vpack.c.bf16 %v646_v57, %v645_v56  ;;  %v624_v56 = vld [vmem:[%s3920_s28 + $0x8e8] sm:$0xff]  ;;  %v655_v57 = vld [vmem:[%s3920_s28 + $0x9e0] sm:$0xff] }
 0x107   : > { %v943_v7 = vcombine.high %v4250_v58, %v4250_v58  ;;  %v3142_v8 = vpack.c.bf16 %v598_v62, %v597_v46  ;;  %v3160_v46 = vpack.c.bf16 %v624_v56, %v623_v34  ;;  %v607_v62 = vld [vmem:[%s3920_s28 + $0x860] sm:$0xff] }
 0x108   : > { %3091 = vmatpush3.bf16.msra.mxu0 %v3090_v3  ;;  %v616_v3 = vld [vmem:[%s3920_s28 + $0x8a8] sm:$0xff]  ;;  %v663_v34 = vld [vmem:[%s3920_s28 + $0xa20] sm:$0xff] }
 0x109   : > { %3123 = vmatpush3.bf16.msra.mxu1 %v3122_v4  ;;  %3093 = vmatprep.subr.bf16.mxu0 %v3092_v5  ;;  %v942_v4 = vcombine.high %v4245_v55, %v4245_v55  ;;  %v647_v5 = vld [vmem:[%s3920_s28 + $0x9a0] sm:$0xff]  ;;  %v3144_v10 = vpack.c.bf16 %v616_v3, %v615_v2  ;;  %v640_v2 = vld [vmem:[%s3920_s28 + $0x968] sm:$0xff]  ;;  %v625_v3 = vld [vmem:[%s3920_s28 + $0x8f0] sm:$0xff] }
 0x10a   : > { %3125 = vmatprep.subr.bf16.mxu1 %v3124_v9  ;;  %v3174_v9 = vpack.c.bf16 %v630_v1, %v629_v63  ;;  %v3176_v15 = vpack.c.bf16 %v648_v6, %v647_v5  ;;  %v608_v63 = vld [vmem:[%s3920_s28 + $0x868] sm:$0xff]  ;;  %v657_v5 = vld [vmem:[%s3920_s28 + $0x9f0] sm:$0xff]  ;;  %v658_v6 = vld [vmem:[%s3920_s28 + $0x9f8] sm:$0xff] }
 0x10b   : > { %v695_v56 = vld [vmem:[%s3920_s28 + $0xb20] sm:$0xff] }
 0x10c   : > { %3095 = vmatpush3.bf16.msra.mxu0 %v3094_v18  ;;  %v617_v18 = vld [vmem:[%s3920_s28 + $0x8b0] sm:$0xff] }
 0x10d   : > { %3127 = vmatpush3.bf16.msra.mxu1 %v3126_v19  ;;  %3097 = vmatprep.subr.bf16.mxu0 %v3096_v20  ;;  %v618_v19 = vld [vmem:[%s3920_s28 + $0x8b8] sm:$0xff] }
 0x10e   : > { %3129 = vmatprep.subr.bf16.mxu1 %v3128_v24  ;;  %v650_v20 = vld [vmem:[%s3920_s28 + $0x9b8] sm:$0xff]  ;;  %v3148_v23 = vpack.c.bf16 %v618_v19, %v617_v18  ;;  %v601_v24 = vld [vmem:[%s3920_s28 + $0x830] sm:$0xff]  ;;  %v675_v18 = vld [vmem:[%s3920_s28 + $0xa80] sm:$0xff] }
 0x10f   : > { %v676_v19 = vld [vmem:[%s3920_s28 + $0xa88] sm:$0xff] }
 0x110   : > { %3099 = vmatpush3.bf16.msra.mxu0 %v3098_v30  ;;  %v620_v30 = vld [vmem:[%s3920_s28 + $0x8c8] sm:$0xff] }
 0x111   : > { %3131 = vmatpush3.bf16.msra.mxu1 %v3130_v32  ;;  %3101 = vmatprep.subr.bf16.mxu0 %v3100_v33  ;;  %v652_v32 = vld [vmem:[%s3920_s28 + $0x9c8] sm:$0xff]  ;;  %v3150_v33 = vpack.c.bf16 %v602_v25, %v601_v24  ;;  %v3152_v43 = vpack.c.bf16 %v620_v30, %v619_v29  ;;  %v3200_v24 = vpack.c.bf16 %v676_v19, %v675_v18  ;;  %v659_v25 = vld [vmem:[%s3920_s28 + $0xa00] sm:$0xff]  ;;  %v677_v30 = vld [vmem:[%s3920_s28 + $0xa90] sm:$0xff] }
 0x112   : > { %3133 = vmatprep.subr.bf16.mxu1 %v3132_v37  ;;  %v604_v37 = vld [vmem:[%s3920_s28 + $0x848] sm:$0xff]  ;;  %v3184_v39 = vpack.c.bf16 %v652_v32, %v651_v31  ;;  %v678_v31 = vld [vmem:[%s3920_s28 + $0xa98] sm:$0xff] }
 0x113   : > { %v692_v29 = vld [vmem:[%s3920_s28 + $0xb08] sm:$0xff] }
 0x114   : > { %3103 = vmatpush3.bf16.msra.mxu0 %v3102_v44  ;;  %v654_v44 = vld [vmem:[%s3920_s28 + $0x9d8] sm:$0xff]  ;;  %v700_v19 = vld [vmem:[%s3920_s28 + $0xb48] sm:$0xff] }
 0x115   : > { %3135 = vmatpush3.bf16.msra.mxu1 %v3134_v45  ;;  %3137 = vmatprep.subr.bf16.mxu0 %v3136_v47  ;;  %v3154_v45 = vpack.c.bf16 %v604_v37, %v603_v36  ;;  %v3186_v47 = vpack.c.bf16 %v636_v40, %v635_v38  ;;  %v3188_v52 = vpack.c.bf16 %v654_v44, %v653_v42  ;;  %v662_v40 = vld [vmem:[%s3920_s28 + $0xa18] sm:$0xff]  ;;  %v679_v44 = vld [vmem:[%s3920_s28 + $0xaa0] sm:$0xff] }
 0x116   : > { %3169 = vmatprep.subr.bf16.mxu1 %v3168_v51  ;;  %v637_v51 = vld [vmem:[%s3920_s28 + $0x950] sm:$0xff]  ;;  %v3202_v36 = vpack.c.bf16 %v660_v26, %v659_v25  ;;  %v3204_v38 = vpack.c.bf16 %v678_v31, %v677_v30  ;;  %v694_v42 = vld [vmem:[%s3920_s28 + $0xb18] sm:$0xff]  ;;  %v687_v31 = vld [vmem:[%s3920_s28 + $0xae0] sm:$0xff] }
 0x117   : > { %1512 = vmatmul.mubr.f32.vlgmr.msra.gmra.mrb[6].mxu0 %v4168_v12  ;;  %v600_v12 = vld [vmem:[%s3920_s28 + $0x828] sm:$0xff]  ;;  %v669_v26 = vld [vmem:[%s3920_s28 + $0xa50] sm:$0xff]  ;;  %v702_v30 = vld [vmem:[%s3920_s28 + $0xb58] sm:$0xff] }
 0x118   : > { %3139 = vmatpush3.bf16.msra.mxu0 %v3138_v59  ;;  %1582 = vmatmul.mubr.f32.vlgmr.msra.gmra.mrb[6].mxu1 %v4173_v16  ;;  %v649_v16 = vld [vmem:[%s3920_s28 + $0x9b0] sm:$0xff]  ;;  %v3146_v21 = vpack.c.bf16 %v600_v12, %v599_v11  ;;  %v656_v59 = vld [vmem:[%s3920_s28 + $0x9e8] sm:$0xff]  ;;  %v610_v12 = vld [vmem:[%s3920_s28 + $0x878] sm:$0xff] }
 0x119   : > { %3171 = vmatpush3.bf16.msra.mxu1 %v3170_v60  ;;  %3141 = vmatprep.subr.bf16.mxu0 %v3140_v61  ;;  %v3180_v27 = vpack.c.bf16 %v650_v20, %v649_v16  ;;  %v3158_v60 = vpack.c.bf16 %v606_v50, %v605_v49  ;;  %v3190_v61 = vpack.c.bf16 %v638_v54, %v637_v51  ;;  %v609_v11 = vld [vmem:[%s3920_s28 + $0x870] sm:$0xff]  ;;  %v707_v16 = vld [vmem:[%s3920_s28 + $0xb80] sm:$0xff]  ;;  %v708_v20 = vld [vmem:[%s3920_s28 + $0xb88] sm:$0xff] }
 0x11a   : > { %3173 = vmatprep.subr.bf16.mxu1 %v3172_v0  ;;  %1651 = vmatprep.mubr.f32.mxu0 %v942_v4  ;;  %v639_v0 = vld [vmem:[%s3920_s28 + $0x960] sm:$0xff]  ;;  %v3192_v1 = vpack.c.bf16 %v656_v59, %v655_v57  ;;  %v626_v4 = vld [vmem:[%s3920_s28 + $0x8f8] sm:$0xff]  ;;  %v3232_v28 = vpack.c.bf16 %v708_v20, %v707_v16  ;;  %v712_v49 = vld [vmem:[%s3920_s28 + $0xba8] sm:$0xff] }
 0x11b   : > { %1721 = vmatprep.mubr.f32.mxu1 %v943_v7  ;;  %v3162_v7 = vpack.c.bf16 %v608_v63, %v607_v62  ;;  %v696_v59 = vld [vmem:[%s3920_s28 + $0xb28] sm:$0xff]  ;;  %v685_v16 = vld [vmem:[%s3920_s28 + $0xad0] sm:$0xff]  ;;  %v686_v20 = vld [vmem:[%s3920_s28 + $0xad8] sm:$0xff] }
 0x11c   : > { %3143 = vmatpush3.bf16.msra.mxu0 %v3142_v8  ;;  %v336_v8 = vld [vmem:[%s3912_s30 + $0x28] sm:$0xff]  ;;  %v3242_v63 = vpack.c.bf16 %v696_v59, %v695_v56  ;;  %v3220_v25 = vpack.c.bf16 %v686_v20, %v685_v16  ;;  %v705_v56 = vld [vmem:[%s3920_s28 + $0xb70] sm:$0xff]  ;;  %v706_v59 = vld [vmem:[%s3920_s28 + $0xb78] sm:$0xff] }
 0x11d   : > { %3175 = vmatpush3.bf16.msra.mxu1 %v3174_v9  ;;  %3145 = vmatprep.subr.bf16.mxu0 %v3144_v10  ;;  %v3194_v9 = vpack.c.bf16 %v640_v2, %v639_v0  ;;  %v3164_v10 = vpack.c.bf16 %v626_v4, %v625_v3  ;;  %v4322_v32 = vrot.slane %v336_v8, %v3985_v14  ;;  %v666_v2 = vld [vmem:[%s3920_s28 + $0xa38] sm:$0xff]  ;;  %v697_v3 = vld [vmem:[%s3920_s28 + $0xb30] sm:$0xff] }
 0x11e   : > { %3177 = vmatprep.subr.bf16.mxu1 %v3176_v15  ;;  %v3196_v15 = vpack.c.bf16 %v658_v6, %v657_v5  ;;  %v698_v5 = vld [vmem:[%s3920_s28 + $0xb38] sm:$0xff]  ;;  %v683_v6 = vld [vmem:[%s3920_s28 + $0xac0] sm:$0xff]  ;;  %v757_v16 = vld [vmem:[%s3920_s28 + $0xd10] sm:$0xff] }
 0x120   : > { %3147 = vmatpush3.bf16.msra.mxu0 %v3146_v21  ;;  %v944_v21 = vcombine.high %v336_v8, %v336_v8  ;;  %v715_v8 = vld [vmem:[%s3920_s28 + $0xbc0] sm:$0xff] }
 0x121   : > { %3179 = vmatpush3.bf16.msra.mxu1 %v3178_v22  ;;  %3149 = vmatprep.subr.bf16.mxu0 %v3148_v23  ;;  %v3166_v22 = vpack.c.bf16 %v610_v12, %v609_v11  ;;  %v3198_v23 = vpack.c.bf16 %v642_v17, %v641_v13  ;;  %v3246_v11 = vpack.c.bf16 %v698_v5, %v697_v3  ;;  %v667_v13 = vld [vmem:[%s3920_s28 + $0xa40] sm:$0xff]  ;;  %v724_v3 = vld [vmem:[%s3920_s28 + $0xc08] sm:$0xff] }
 0x122   : > { %3181 = vmatprep.subr.bf16.mxu1 %v3180_v27  ;;  %v691_v27 = vld [vmem:[%s3920_s28 + $0xb00] sm:$0xff] }
 0x123   : > { %v3234_v37 = vpack.c.bf16 %v692_v29, %v691_v27  ;;  %v699_v17 = vld [vmem:[%s3920_s28 + $0xb40] sm:$0xff]  ;;  %v670_v27 = vld [vmem:[%s3920_s28 + $0xa58] sm:$0xff] }
 0x124   : > { %3151 = vmatpush3.bf16.msra.mxu0 %v3150_v33  ;;  %v709_v33 = vld [vmem:[%s3920_s28 + $0xb90] sm:$0xff] }
 0x125   : > { %3183 = vmatpush3.bf16.msra.mxu1 %v3182_v35  ;;  %3153 = vmatprep.subr.bf16.mxu0 %v3152_v43  ;;  %v710_v35 = vld [vmem:[%s3920_s28 + $0xb98] sm:$0xff]  ;;  %v4327_v43 = vrot.slane %v944_v21, %v3985_v14  ;;  %v717_v21 = vld [vmem:[%s3920_s28 + $0xbd0] sm:$0xff] }
 0x126   : > { %3185 = vmatprep.subr.bf16.mxu1 %v3184_v39  ;;  %v661_v39 = vld [vmem:[%s3920_s28 + $0xa10] sm:$0xff]  ;;  %v3236_v41 = vpack.c.bf16 %v710_v35, %v709_v33  ;;  %v688_v33 = vld [vmem:[%s3920_s28 + $0xae8] sm:$0xff]  ;;  %v719_v35 = vld [vmem:[%s3920_s28 + $0xbe0] sm:$0xff] }
 0x127   : > { %v960_v50 = vcombine.high %v4327_v43, %v4327_v43  ;;  %v3206_v51 = vpack.c.bf16 %v662_v40, %v661_v39  ;;  %v3224_v39 = vpack.c.bf16 %v688_v33, %v687_v31  ;;  %v671_v40 = vld [vmem:[%s3920_s28 + $0xa60] sm:$0xff] }
 0x128   : > { %3155 = vmatpush3.bf16.msra.mxu0 %v3154_v45  ;;  %v680_v45 = vld [vmem:[%s3920_s28 + $0xaa8] sm:$0xff]  ;;  %v727_v31 = vld [vmem:[%s3920_s28 + $0xc20] sm:$0xff] }
 0x129   : > { %3187 = vmatpush3.bf16.msra.mxu1 %v3186_v47  ;;  %3157 = vmatprep.subr.bf16.mxu0 %v3156_v48  ;;  %v959_v47 = vcombine.high %v4322_v32, %v4322_v32  ;;  %v711_v48 = vld [vmem:[%s3920_s28 + $0xba0] sm:$0xff]  ;;  %v3208_v54 = vpack.c.bf16 %v680_v45, %v679_v44  ;;  %v704_v44 = vld [vmem:[%s3920_s28 + $0xb68] sm:$0xff]  ;;  %v689_v45 = vld [vmem:[%s3920_s28 + $0xaf0] sm:$0xff] }
 0x12a   : > { %3189 = vmatprep.subr.bf16.mxu1 %v3188_v52  ;;  %v3238_v52 = vpack.c.bf16 %v694_v42, %v693_v53  ;;  %v3240_v57 = vpack.c.bf16 %v712_v49, %v711_v48  ;;  %v672_v53 = vld [vmem:[%s3920_s28 + $0xa68] sm:$0xff]  ;;  %v721_v48 = vld [vmem:[%s3920_s28 + $0xbf0] sm:$0xff]  ;;  %v722_v49 = vld [vmem:[%s3920_s28 + $0xbf8] sm:$0xff] }
 0x12b   : > { %v759_v33 = vld [vmem:[%s3920_s28 + $0xd20] sm:$0xff] }
 0x12c   : > { %3159 = vmatpush3.bf16.msra.mxu0 %v3158_v60  ;;  %v681_v60 = vld [vmem:[%s3920_s28 + $0xab0] sm:$0xff] }
 0x12d   : > { %3191 = vmatpush3.bf16.msra.mxu1 %v3190_v61  ;;  %3161 = vmatprep.subr.bf16.mxu0 %v3160_v46  ;;  %v682_v61 = vld [vmem:[%s3920_s28 + $0xab8] sm:$0xff] }
 0x12e   : > { %3193 = vmatprep.subr.bf16.mxu1 %v3192_v1  ;;  %v714_v46 = vld [vmem:[%s3920_s28 + $0xbb8] sm:$0xff]  ;;  %v3212_v0 = vpack.c.bf16 %v682_v61, %v681_v60  ;;  %v665_v1 = vld [vmem:[%s3920_s28 + $0xa30] sm:$0xff]  ;;  %v739_v60 = vld [vmem:[%s3920_s28 + $0xc80] sm:$0xff] }
 0x12f   : > { %v740_v61 = vld [vmem:[%s3920_s28 + $0xc88] sm:$0xff] }
 0x130   : > { %3163 = vmatpush3.bf16.msra.mxu0 %v3162_v7  ;;  %v684_v7 = vld [vmem:[%s3920_s28 + $0xac8] sm:$0xff] }
 0x131   : > { %3195 = vmatpush3.bf16.msra.mxu1 %v3194_v9  ;;  %3165 = vmatprep.subr.bf16.mxu0 %v3164_v10  ;;  %v716_v9 = vld [vmem:[%s3920_s28 + $0xbc8] sm:$0xff]  ;;  %v3214_v10 = vpack.c.bf16 %v666_v2, %v665_v1  ;;  %v3216_v12 = vpack.c.bf16 %v684_v7, %v683_v6  ;;  %v3264_v1 = vpack.c.bf16 %v740_v61, %v739_v60  ;;  %v723_v2 = vld [vmem:[%s3920_s28 + $0xc00] sm:$0xff]  ;;  %v741_v7 = vld [vmem:[%s3920_s28 + $0xc90] sm:$0xff] }
 0x132   : > { %3197 = vmatprep.subr.bf16.mxu1 %v3196_v15  ;;  %v668_v15 = vld [vmem:[%s3920_s28 + $0xa48] sm:$0xff]  ;;  %v3248_v18 = vpack.c.bf16 %v716_v9, %v715_v8  ;;  %v742_v8 = vld [vmem:[%s3920_s28 + $0xc98] sm:$0xff] }
 0x133   : > { %v756_v6 = vld [vmem:[%s3920_s28 + $0xd08] sm:$0xff] }
 0x134   : > { %3167 = vmatpush3.bf16.msra.mxu0 %v3166_v22  ;;  %v718_v22 = vld [vmem:[%s3920_s28 + $0xbd8] sm:$0xff]  ;;  %v764_v61 = vld [vmem:[%s3920_s28 + $0xd48] sm:$0xff] }
 0x135   : > { %3199 = vmatpush3.bf16.msra.mxu1 %v3198_v23  ;;  %3201 = vmatprep.subr.bf16.mxu0 %v3200_v24  ;;  %v3218_v23 = vpack.c.bf16 %v668_v15, %v667_v13  ;;  %v3250_v24 = vpack.c.bf16 %v700_v19, %v699_v17  ;;  %v3252_v29 = vpack.c.bf16 %v718_v22, %v717_v21  ;;  %v726_v19 = vld [vmem:[%s3920_s28 + $0xc18] sm:$0xff]  ;;  %v743_v22 = vld [vmem:[%s3920_s28 + $0xca0] sm:$0xff] }
 0x136   : > { %3233 = vmatprep.subr.bf16.mxu1 %v3232_v28  ;;  %v701_v28 = vld [vmem:[%s3920_s28 + $0xb50] sm:$0xff]  ;;  %v3266_v13 = vpack.c.bf16 %v724_v3, %v723_v2  ;;  %v3268_v17 = vpack.c.bf16 %v742_v8, %v741_v7  ;;  %v758_v21 = vld [vmem:[%s3920_s28 + $0xd18] sm:$0xff]  ;;  %v751_v8 = vld [vmem:[%s3920_s28 + $0xce0] sm:$0xff] }
 0x137   : > { %1652 = vmatmul.mubr.f32.vlgmr.msra.gmra.mrb[8].mxu0 %v4245_v55  ;;  %v664_v55 = vld [vmem:[%s3920_s28 + $0xa28] sm:$0xff]  ;;  %v733_v3 = vld [vmem:[%s3920_s28 + $0xc50] sm:$0xff]  ;;  %v766_v7 = vld [vmem:[%s3920_s28 + $0xd58] sm:$0xff] }
 0x138   : > { %3203 = vmatpush3.bf16.msra.mxu0 %v3202_v36  ;;  %1722 = vmatmul.mubr.f32.vlgmr.msra.gmra.mrb[8].mxu1 %v4250_v58  ;;  %v713_v58 = vld [vmem:[%s3920_s28 + $0xbb0] sm:$0xff]  ;;  %v3210_v62 = vpack.c.bf16 %v664_v55, %v663_v34  ;;  %v720_v36 = vld [vmem:[%s3920_s28 + $0xbe8] sm:$0xff]  ;;  %v674_v55 = vld [vmem:[%s3920_s28 + $0xa78] sm:$0xff] }
 0x139   : > { %3235 = vmatpush3.bf16.msra.mxu1 %v3234_v37  ;;  %3205 = vmatprep.subr.bf16.mxu0 %v3204_v38  ;;  %v3244_v4 = vpack.c.bf16 %v714_v46, %v713_v58  ;;  %v3222_v37 = vpack.c.bf16 %v670_v27, %v669_v26  ;;  %v3254_v38 = vpack.c.bf16 %v702_v30, %v701_v28  ;;  %v673_v34 = vld [vmem:[%s3920_s28 + $0xa70] sm:$0xff]  ;;  %v771_v58 = vld [vmem:[%s3920_s28 + $0xd80] sm:$0xff]  ;;  %v772_v46 = vld [vmem:[%s3920_s28 + $0xd88] sm:$0xff] }
 0x13a   : > { %3237 = vmatprep.subr.bf16.mxu1 %v3236_v41  ;;  %1791 = vmatprep.mubr.f32.mxu0 %v959_v47  ;;  %v703_v41 = vld [vmem:[%s3920_s28 + $0xb60] sm:$0xff]  ;;  %v3256_v42 = vpack.c.bf16 %v720_v36, %v719_v35  ;;  %v690_v47 = vld [vmem:[%s3920_s28 + $0xaf8] sm:$0xff]  ;;  %v3296_v5 = vpack.c.bf16 %v772_v46, %v771_v58  ;;  %v776_v26 = vld [vmem:[%s3920_s28 + $0xda8] sm:$0xff] }
 0x13b   : > { %1861 = vmatprep.mubr.f32.mxu1 %v960_v50  ;;  %v3226_v50 = vpack.c.bf16 %v672_v53, %v671_v40  ;;  %v760_v36 = vld [vmem:[%s3920_s28 + $0xd28] sm:$0xff]  ;;  %v749_v58 = vld [vmem:[%s3920_s28 + $0xcd0] sm:$0xff]  ;;  %v750_v46 = vld [vmem:[%s3920_s28 + $0xcd8] sm:$0xff] }
 0x13c   : > { %3207 = vmatpush3.bf16.msra.mxu0 %v3206_v51  ;;  %v337_v51 = vld [vmem:[%s3912_s30 + $0x30] sm:$0xff]  ;;  %v3306_v53 = vpack.c.bf16 %v760_v36, %v759_v33  ;;  %v3284_v2 = vpack.c.bf16 %v750_v46, %v749_v58  ;;  %v770_v36 = vld [vmem:[%s3920_s28 + $0xd78] sm:$0xff] }
 0x13d   : > { %3239 = vmatpush3.bf16.msra.mxu1 %v3238_v52  ;;  %3209 = vmatprep.subr.bf16.mxu0 %v3208_v54  ;;  %v3258_v52 = vpack.c.bf16 %v704_v44, %v703_v41  ;;  %v3228_v54 = vpack.c.bf16 %v690_v47, %v689_v45  ;;  %v4399_v9 = vrot.slane %v337_v51, %v3985_v14  ;;  %v730_v44 = vld [vmem:[%s3920_s28 + $0xc38] sm:$0xff]  ;;  %v761_v45 = vld [vmem:[%s3920_s28 + $0xd30] sm:$0xff] }
 0x13e   : > { %3241 = vmatprep.subr.bf16.mxu1 %v3240_v57  ;;  %v3260_v57 = vpack.c.bf16 %v722_v49, %v721_v48  ;;  %v762_v48 = vld [vmem:[%s3920_s28 + $0xd38] sm:$0xff]  ;;  %v747_v49 = vld [vmem:[%s3920_s28 + $0xcc0] sm:$0xff]  ;;  %v769_v33 = vld [vmem:[%s3920_s28 + $0xd70] sm:$0xff] }
 0x13f   : > { %v821_v58 = vld [vmem:[%s3920_s28 + $0xf10] sm:$0xff] }
 0x140   : > { %3211 = vmatpush3.bf16.msra.mxu0 %v3210_v62  ;;  %v961_v62 = vcombine.high %v337_v51, %v337_v51  ;;  %v779_v51 = vld [vmem:[%s3920_s28 + $0xdc0] sm:$0xff] }
 0x141   : > { %3243 = vmatpush3.bf16.msra.mxu1 %v3242_v63  ;;  %3213 = vmatprep.subr.bf16.mxu0 %v3212_v0  ;;  %v3230_v63 = vpack.c.bf16 %v674_v55, %v673_v34  ;;  %v3262_v0 = vpack.c.bf16 %v706_v59, %v705_v56  ;;  %v3310_v34 = vpack.c.bf16 %v762_v48, %v761_v45  ;;  %v731_v56 = vld [vmem:[%s3920_s28 + $0xc40] sm:$0xff]  ;;  %v788_v45 = vld [vmem:[%s3920_s28 + $0xe08] sm:$0xff] }
 0x142   : > { %3245 = vmatprep.subr.bf16.mxu1 %v3244_v4  ;;  %v755_v4 = vld [vmem:[%s3920_s28 + $0xd00] sm:$0xff] }
 0x143   : > { %v3298_v15 = vpack.c.bf16 %v756_v6, %v755_v4  ;;  %v763_v59 = vld [vmem:[%s3920_s28 + $0xd40] sm:$0xff]  ;;  %v734_v4 = vld [vmem:[%s3920_s28 + $0xc58] sm:$0xff] }
 0x144   : > { %3215 = vmatpush3.bf16.msra.mxu0 %v3214_v10  ;;  %v773_v10 = vld [vmem:[%s3920_s28 + $0xd90] sm:$0xff] }
 0x145   : > { %3247 = vmatpush3.bf16.msra.mxu1 %v3246_v11  ;;  %3217 = vmatprep.subr.bf16.mxu0 %v3216_v12  ;;  %v774_v11 = vld [vmem:[%s3920_s28 + $0xd98] sm:$0xff]  ;;  %v4404_v12 = vrot.slane %v961_v62, %v3985_v14  ;;  %v781_v62 = vld [vmem:[%s3920_s28 + $0xdd0] sm:$0xff] }
 0x146   : > { %3249 = vmatprep.subr.bf16.mxu1 %v3248_v18  ;;  %v725_v18 = vld [vmem:[%s3920_s28 + $0xc10] sm:$0xff]  ;;  %v3300_v20 = vpack.c.bf16 %v774_v11, %v773_v10  ;;  %v752_v10 = vld [vmem:[%s3920_s28 + $0xce8] sm:$0xff]  ;;  %v783_v11 = vld [vmem:[%s3920_s28 + $0xde0] sm:$0xff] }
 0x147   : > { %v977_v27 = vcombine.high %v4404_v12, %v4404_v12  ;;  %v3270_v28 = vpack.c.bf16 %v726_v19, %v725_v18  ;;  %v3288_v18 = vpack.c.bf16 %v752_v10, %v751_v8  ;;  %v735_v19 = vld [vmem:[%s3920_s28 + $0xc60] sm:$0xff] }
 0x148   : > { %3219 = vmatpush3.bf16.msra.mxu0 %v3218_v23  ;;  %v744_v23 = vld [vmem:[%s3920_s28 + $0xca8] sm:$0xff]  ;;  %v823_v8 = vld [vmem:[%s3920_s28 + $0xf20] sm:$0xff] }
 0x149   : > { %3251 = vmatpush3.bf16.msra.mxu1 %v3250_v24  ;;  %3221 = vmatprep.subr.bf16.mxu0 %v3220_v25  ;;  %v976_v24 = vcombine.high %v4399_v9, %v4399_v9  ;;  %v775_v25 = vld [vmem:[%s3920_s28 + $0xda0] sm:$0xff]  ;;  %v3272_v30 = vpack.c.bf16 %v744_v23, %v743_v22  ;;  %v768_v22 = vld [vmem:[%s3920_s28 + $0xd68] sm:$0xff]  ;;  %v753_v23 = vld [vmem:[%s3920_s28 + $0xcf0] sm:$0xff] }
 0x14a   : > { %3253 = vmatprep.subr.bf16.mxu1 %v3252_v29  ;;  %v3302_v29 = vpack.c.bf16 %v758_v21, %v757_v16  ;;  %v3304_v35 = vpack.c.bf16 %v776_v26, %v775_v25  ;;  %v736_v16 = vld [vmem:[%s3920_s28 + $0xc68] sm:$0xff]  ;;  %v785_v25 = vld [vmem:[%s3920_s28 + $0xdf0] sm:$0xff]  ;;  %v786_v26 = vld [vmem:[%s3920_s28 + $0xdf8] sm:$0xff] }
 0x14c   : > { %3223 = vmatpush3.bf16.msra.mxu0 %v3222_v37  ;;  %v745_v37 = vld [vmem:[%s3920_s28 + $0xcb0] sm:$0xff] }
 0x14d   : > { %3255 = vmatpush3.bf16.msra.mxu1 %v3254_v38  ;;  %3225 = vmatprep.subr.bf16.mxu0 %v3224_v39  ;;  %v746_v38 = vld [vmem:[%s3920_s28 + $0xcb8] sm:$0xff] }
 0x14e   : > { %3257 = vmatprep.subr.bf16.mxu1 %v3256_v42  ;;  %v778_v39 = vld [vmem:[%s3920_s28 + $0xdb8] sm:$0xff]  ;;  %v3276_v41 = vpack.c.bf16 %v746_v38, %v745_v37  ;;  %v729_v42 = vld [vmem:[%s3920_s28 + $0xc30] sm:$0xff]  ;;  %v803_v37 = vld [vmem:[%s3920_s28 + $0xe80] sm:$0xff] }
 0x14f   : > { %v804_v38 = vld [vmem:[%s3920_s28 + $0xe88] sm:$0xff] }
 0x150   : > { %3227 = vmatpush3.bf16.msra.mxu0 %v3226_v50  ;;  %v748_v50 = vld [vmem:[%s3920_s28 + $0xcc8] sm:$0xff] }
 0x151   : > { %3259 = vmatpush3.bf16.msra.mxu1 %v3258_v52  ;;  %3229 = vmatprep.subr.bf16.mxu0 %v3228_v54  ;;  %v780_v52 = vld [vmem:[%s3920_s28 + $0xdc8] sm:$0xff]  ;;  %v3278_v54 = vpack.c.bf16 %v730_v44, %v729_v42  ;;  %v3280_v55 = vpack.c.bf16 %v748_v50, %v747_v49  ;;  %v3328_v42 = vpack.c.bf16 %v804_v38, %v803_v37  ;;  %v787_v44 = vld [vmem:[%s3920_s28 + $0xe00] sm:$0xff]  ;;  %v805_v50 = vld [vmem:[%s3920_s28 + $0xe90] sm:$0xff] }
 0x152   : > { %3261 = vmatprep.subr.bf16.mxu1 %v3260_v57  ;;  %v732_v57 = vld [vmem:[%s3920_s28 + $0xc48] sm:$0xff]  ;;  %v3312_v60 = vpack.c.bf16 %v780_v52, %v779_v51  ;;  %v806_v51 = vld [vmem:[%s3920_s28 + $0xe98] sm:$0xff]  ;;  %v813_v38 = vld [vmem:[%s3920_s28 + $0xed0] sm:$0xff] }
 0x153   : > { %v820_v49 = vld [vmem:[%s3920_s28 + $0xf08] sm:$0xff] }
 0x154   : > { %3231 = vmatpush3.bf16.msra.mxu0 %v3230_v63  ;;  %v782_v63 = vld [vmem:[%s3920_s28 + $0xdd8] sm:$0xff]  ;;  %v828_v37 = vld [vmem:[%s3920_s28 + $0xf48] sm:$0xff] }
 0x155   : > { %3263 = vmatpush3.bf16.msra.mxu1 %v3262_v0  ;;  %3265 = vmatprep.subr.bf16.mxu0 %v3264_v1  ;;  %v3282_v0 = vpack.c.bf16 %v732_v57, %v731_v56  ;;  %v3314_v1 = vpack.c.bf16 %v764_v61, %v763_v59  ;;  %v3316_v6 = vpack.c.bf16 %v782_v63, %v781_v62  ;;  %v790_v61 = vld [vmem:[%s3920_s28 + $0xe18] sm:$0xff]  ;;  %v807_v63 = vld [vmem:[%s3920_s28 + $0xea0] sm:$0xff] }
 0x156   : > { %3297 = vmatprep.subr.bf16.mxu1 %v3296_v5  ;;  %v765_v5 = vld [vmem:[%s3920_s28 + $0xd50] sm:$0xff]  ;;  %v3330_v56 = vpack.c.bf16 %v788_v45, %v787_v44  ;;  %v3332_v59 = vpack.c.bf16 %v806_v51, %v805_v50  ;;  %v822_v62 = vld [vmem:[%s3920_s28 + $0xf18] sm:$0xff]  ;;  %v815_v50 = vld [vmem:[%s3920_s28 + $0xee0] sm:$0xff] }
 0x157   : > { %1792 = vmatmul.mubr.f32.vlgmr.msra.gmra.mrb[10].mxu0 %v4322_v32  ;;  %v728_v32 = vld [vmem:[%s3920_s28 + $0xc28] sm:$0xff]  ;;  %v797_v44 = vld [vmem:[%s3920_s28 + $0xe50] sm:$0xff]  ;;  %v798_v45 = vld [vmem:[%s3920_s28 + $0xe58] sm:$0xff] }
 0x158   : > { %3267 = vmatpush3.bf16.msra.mxu0 %v3266_v13  ;;  %1862 = vmatmul.mubr.f32.vlgmr.msra.gmra.mrb[10].mxu1 %v4327_v43  ;;  %v777_v43 = vld [vmem:[%s3920_s28 + $0xdb0] sm:$0xff]  ;;  %v3274_v40 = vpack.c.bf16 %v728_v32, %v727_v31  ;;  %v784_v13 = vld [vmem:[%s3920_s28 + $0xde8] sm:$0xff]  ;;  %v738_v32 = vld [vmem:[%s3920_s28 + $0xc78] sm:$0xff] }
 0x159   : > { %3299 = vmatpush3.bf16.msra.mxu1 %v3298_v15  ;;  %3269 = vmatprep.subr.bf16.mxu0 %v3268_v17  ;;  %v3308_v47 = vpack.c.bf16 %v778_v39, %v777_v43  ;;  %v3286_v15 = vpack.c.bf16 %v734_v4, %v733_v3  ;;  %v3318_v17 = vpack.c.bf16 %v766_v7, %v765_v5  ;;  %v737_v31 = vld [vmem:[%s3920_s28 + $0xc70] sm:$0xff]  ;;  %v835_v43 = vld [vmem:[%s3920_s28 + $0xf80] sm:$0xff]  ;;  %v836_v39 = vld [vmem:[%s3920_s28 + $0xf88] sm:$0xff] }
 0x15a   : > { %3301 = vmatprep.subr.bf16.mxu1 %v3300_v20  ;;  %1931 = vmatprep.mubr.f32.mxu0 %v976_v24  ;;  %v767_v20 = vld [vmem:[%s3920_s28 + $0xd60] sm:$0xff]  ;;  %v3320_v21 = vpack.c.bf16 %v784_v13, %v783_v11  ;;  %v754_v24 = vld [vmem:[%s3920_s28 + $0xcf8] sm:$0xff]  ;;  %v3360_v48 = vpack.c.bf16 %v836_v39, %v835_v43  ;;  %v3366_v5 = vpack.c.bf16 %v822_v62, %v821_v58  ;;  %v824_v11 = vld [vmem:[%s3920_s28 + $0xf28] sm:$0xff] }
 0x15b   : > { %2001 = vmatprep.mubr.f32.mxu1 %v977_v27  ;;  %v3290_v27 = vpack.c.bf16 %v736_v16, %v735_v19  ;;  %v791_v7 = vld [vmem:[%s3920_s28 + $0xe20] sm:$0xff]  ;;  %v809_v13 = vld [vmem:[%s3920_s28 + $0xeb0] sm:$0xff]  ;;  %v3370_v19 = vpack.c.bf16 %v824_v11, %v823_v8  ;;  %v814_v43 = vld [vmem:[%s3920_s28 + $0xed8] sm:$0xff] }
 0x15c   : > { %3271 = vmatpush3.bf16.msra.mxu0 %v3270_v28  ;;  %v338_v28 = vld [vmem:[%s3912_s30 + $0x38] sm:$0xff]  ;;  %v845_v39 = vld [vmem:[%s3920_s28 + $0xfd0] sm:$0xff]  ;;  %v816_v51 = vld [vmem:[%s3920_s28 + $0xee8] sm:$0xff] }
 0x15d   : > { %3303 = vmatpush3.bf16.msra.mxu1 %v3302_v29  ;;  %3273 = vmatprep.subr.bf16.mxu0 %v3272_v30  ;;  %v3322_v29 = vpack.c.bf16 %v768_v22, %v767_v20  ;;  %v3292_v30 = vpack.c.bf16 %v754_v24, %v753_v23  ;;  %v4476_v52 = vrot.slane %v338_v28, %v3985_v14  ;;  %v793_v20 = vld [vmem:[%s3920_s28 + $0xe30] sm:$0xff]  ;;  %v826_v24 = vld [vmem:[%s3920_s28 + $0xf38] sm:$0xff]  ;;  %v831_v58 = vld [vmem:[%s3920_s28 + $0xf60] sm:$0xff] }
 0x15e   : > { %3305 = vmatprep.subr.bf16.mxu1 %v3304_v35  ;;  %v3324_v35 = vpack.c.bf16 %v786_v26, %v785_v25  ;;  %v825_v22 = vld [vmem:[%s3920_s28 + $0xf30] sm:$0xff]  ;;  %v811_v25 = vld [vmem:[%s3920_s28 + $0xec0] sm:$0xff]  ;;  %v812_v26 = vld [vmem:[%s3920_s28 + $0xec8] sm:$0xff] }
 0x15f   : > { %v801_v11 = vld [vmem:[%s3920_s28 + $0xe70] sm:$0xff] }
 0x160   : > { %3275 = vmatpush3.bf16.msra.mxu0 %v3274_v40  ;;  %v978_v40 = vcombine.high %v338_v28, %v338_v28  ;;  %v844_v28 = vld [vmem:[%s3920_s28 + $0xfc8] sm:$0xff] }
 0x161   : > { %3307 = vmatpush3.bf16.msra.mxu1 %v3306_v53  ;;  %3277 = vmatprep.subr.bf16.mxu0 %v3276_v41  ;;  %v3294_v53 = vpack.c.bf16 %v738_v32, %v737_v31  ;;  %v3326_v41 = vpack.c.bf16 %v770_v36, %v769_v33  ;;  %v3344_v31 = vpack.c.bf16 %v812_v26, %v811_v25  ;;  %v795_v32 = vld [vmem:[%s3920_s28 + $0xe40] sm:$0xff]  ;;  %v796_v33 = vld [vmem:[%s3920_s28 + $0xe48] sm:$0xff] }
 0x162   : > { %3309 = vmatprep.subr.bf16.mxu1 %v3308_v47  ;;  %v819_v47 = vld [vmem:[%s3920_s28 + $0xf00] sm:$0xff] }
 0x163   : > { %v3362_v57 = vpack.c.bf16 %v820_v49, %v819_v47  ;;  %v829_v47 = vld [vmem:[%s3920_s28 + $0xf50] sm:$0xff]  ;;  %v830_v49 = vld [vmem:[%s3920_s28 + $0xf58] sm:$0xff] }
 0x164   : > { %3279 = vmatpush3.bf16.msra.mxu0 %v3278_v54  ;;  %v837_v54 = vld [vmem:[%s3920_s28 + $0xf90] sm:$0xff] }
 0x165   : > { %3311 = vmatpush3.bf16.msra.mxu1 %v3310_v34  ;;  %3281 = vmatprep.subr.bf16.mxu0 %v3280_v55  ;;  %v838_v34 = vld [vmem:[%s3920_s28 + $0xf98] sm:$0xff]  ;;  %v4481_v55 = vrot.slane %v978_v40, %v3985_v14  ;;  %v808_v14 = vld [vmem:[%s3920_s28 + $0xea8] sm:$0xff] }
 0x166   : > { %3313 = vmatprep.subr.bf16.mxu1 %v3312_v60  ;;  %v789_v60 = vld [vmem:[%s3920_s28 + $0xe10] sm:$0xff]  ;;  %v3364_v46 = vpack.c.bf16 %v838_v34, %v837_v54  ;;  %v846_v40 = vld [vmem:[%s3920_s28 + $0xfd8] sm:$0xff]  ;;  %v847_v54 = vld [vmem:[%s3920_s28 + $0xfe0] sm:$0xff] }
 0x167   : > { %v994_v3 = vcombine.high %v4481_v55, %v4481_v55  ;;  %v3334_v4 = vpack.c.bf16 %v790_v61, %v789_v60  ;;  %v848_v34 = vld [vmem:[%s3920_s28 + $0xfe8] sm:$0xff]  ;;  %v799_v60 = vld [vmem:[%s3920_s28 + $0xe60] sm:$0xff] }
 0x168   : > { %3283 = vmatpush3.bf16.msra.mxu0 %v3282_v0  ;;  %v993_v0 = vcombine.high %v4476_v52, %v4476_v52  ;;  %v800_v61 = vld [vmem:[%s3920_s28 + $0xe68] sm:$0xff]  ;;  %v3384_v62 = vpack.c.bf16 %v848_v34, %v847_v54 }
 0x169   : > { %3315 = vmatpush3.bf16.msra.mxu1 %v3314_v1  ;;  %3285 = vmatprep.subr.bf16.mxu0 %v3284_v2  ;;  %v839_v1 = vld [vmem:[%s3920_s28 + $0xfa0] sm:$0xff]  ;;  %v840_v2 = vld [vmem:[%s3920_s28 + $0xfa8] sm:$0xff] }
 0x16a   : > { %3317 = vmatprep.subr.bf16.mxu1 %v3316_v6  ;;  %v3336_v6 = vpack.c.bf16 %v808_v14, %v807_v63  ;;  %v3368_v10 = vpack.c.bf16 %v840_v2, %v839_v1  ;;  %v832_v63 = vld [vmem:[%s3920_s28 + $0xf68] sm:$0xff]  ;;  %v817_v14 = vld [vmem:[%s3920_s28 + $0xef0] sm:$0xff] }
 0x16b   : > { %v3386_v8 = vpack.c.bf16 %v832_v63, %v831_v58 }
 0x16c   : > { %3287 = vmatpush3.bf16.msra.mxu0 %v3286_v15  ;;  %v810_v15 = vld [vmem:[%s3920_s28 + $0xeb8] sm:$0xff] }
 0x16d   : > { %3319 = vmatpush3.bf16.msra.mxu1 %v3318_v17  ;;  %3289 = vmatprep.subr.bf16.mxu0 %v3288_v18  ;;  %v842_v17 = vld [vmem:[%s3920_s28 + $0xfb8] sm:$0xff]  ;;  %v3340_v16 = vpack.c.bf16 %v810_v15, %v809_v13 }
 0x16e   : > { %3321 = vmatprep.subr.bf16.mxu1 %v3320_v21  ;;  %v794_v21 = vld [vmem:[%s3920_s28 + $0xe38] sm:$0xff] }
 0x16f   : > { %v802_v13 = vld [vmem:[%s3920_s28 + $0xe78] sm:$0xff] }
 0x170   : > { %3291 = vmatpush3.bf16.msra.mxu0 %v3290_v27  ;;  %v843_v27 = vld [vmem:[%s3920_s28 + $0xfc0] sm:$0xff] }
 0x171   : > { %3323 = vmatpush3.bf16.msra.mxu1 %v3322_v29  ;;  %3293 = vmatprep.subr.bf16.mxu0 %v3292_v30  ;;  %v3342_v29 = vpack.c.bf16 %v794_v21, %v793_v20  ;;  %v3374_v30 = vpack.c.bf16 %v826_v24, %v825_v22  ;;  %v3376_v36 = vpack.c.bf16 %v844_v28, %v843_v27 }
 0x172   : > { %3325 = vmatprep.subr.bf16.mxu1 %v3324_v35  ;;  %v827_v35 = vld [vmem:[%s3920_s28 + $0xf40] sm:$0xff] }
 0x174   : > { %3295 = vmatpush3.bf16.msra.mxu0 %v3294_v53  ;;  %v3346_v53 = vpack.c.bf16 %v796_v33, %v795_v32 }
 0x175   : > { %3327 = vmatpush3.bf16.msra.mxu1 %v3326_v41  ;;  %3329 = vmatprep.subr.bf16.mxu0 %v3328_v42  ;;  %v3378_v41 = vpack.c.bf16 %v828_v37, %v827_v35  ;;  %v3348_v42 = vpack.c.bf16 %v814_v43, %v813_v38 }
 0x176   : > { %3361 = vmatprep.subr.bf16.mxu1 %v3360_v48  ;;  %v3380_v48 = vpack.c.bf16 %v846_v40, %v845_v39 }
 0x177   : > { %1932 = vmatmul.mubr.f32.vlgmr.msra.gmra.mrb[12].mxu0 %v4399_v9  ;;  %v792_v9 = vld [vmem:[%s3920_s28 + $0xe28] sm:$0xff] }
 0x178   : > { %3331 = vmatpush3.bf16.msra.mxu0 %v3330_v56  ;;  %2002 = vmatmul.mubr.f32.vlgmr.msra.gmra.mrb[12].mxu1 %v4404_v12  ;;  %v841_v12 = vld [vmem:[%s3920_s28 + $0xfb0] sm:$0xff]  ;;  %v3338_v18 = vpack.c.bf16 %v792_v9, %v791_v7  ;;  %v3350_v56 = vpack.c.bf16 %v798_v45, %v797_v44  ;;  %v3354_v7 = vpack.c.bf16 %v800_v61, %v799_v60 }
 0x179   : > { %3363 = vmatpush3.bf16.msra.mxu1 %v3362_v57  ;;  %3333 = vmatprep.subr.bf16.mxu0 %v3332_v59  ;;  %v3372_v23 = vpack.c.bf16 %v842_v17, %v841_v12  ;;  %v3382_v57 = vpack.c.bf16 %v830_v49, %v829_v47  ;;  %v3352_v59 = vpack.c.bf16 %v816_v51, %v815_v50  ;;  %v833_v12 = vld [vmem:[%s3920_s28 + $0xf70] sm:$0xff]  ;;  %v834_v17 = vld [vmem:[%s3920_s28 + $0xf78] sm:$0xff] }
 0x17a   : > { %3365 = vmatprep.subr.bf16.mxu1 %v3364_v46  ;;  %2071 = vmatprep.mubr.f32.mxu0 %v993_v0  ;;  %v818_v0 = vld [vmem:[%s3920_s28 + $0xef8] sm:$0xff] }
 0x17b   : > { %2141 = vmatprep.mubr.f32.mxu1 %v994_v3  ;;  %v849_v3 = vld [vmem:[%s3920_s28 + $0xff0] sm:$0xff] }
 0x17c   : > { %3335 = vmatpush3.bf16.msra.mxu0 %v3334_v4  ;;  %v850_v4 = vld [vmem:[%s3920_s28 + $0xff8] sm:$0xff] }
 0x17d   : > { %3367 = vmatpush3.bf16.msra.mxu1 %v3366_v5  ;;  %3337 = vmatprep.subr.bf16.mxu0 %v3336_v6  ;;  %v3388_v15 = vpack.c.bf16 %v850_v4, %v849_v3 }
 0x17e   : > { %3369 = vmatprep.subr.bf16.mxu1 %v3368_v10  ;;  %v3356_v10 = vpack.c.bf16 %v818_v0, %v817_v14 }
 0x180   : > { %3339 = vmatpush3.bf16.msra.mxu0 %v3338_v18 }
 0x181   : > { %3371 = vmatpush3.bf16.msra.mxu1 %v3370_v19  ;;  %3341 = vmatprep.subr.bf16.mxu0 %v3340_v16  ;;  %v3358_v19 = vpack.c.bf16 %v802_v13, %v801_v11  ;;  %v3390_v16 = vpack.c.bf16 %v834_v17, %v833_v12  ;;  %v2313_v12 = vld [vmem:[#allocation8] ss:$0 sm:$0xff] (!%p2312_p5) }
 0x182   : > { %3373 = vmatprep.subr.bf16.mxu1 %v3372_v23 }
 0x184   : > { %3343 = vmatpush3.bf16.msra.mxu0 %v3342_v29 }
 0x185   : > { %3375 = vmatpush3.bf16.msra.mxu1 %v3374_v30  ;;  %3345 = vmatprep.subr.bf16.mxu0 %v3344_v31 }
 0x186   : > { %3377 = vmatprep.subr.bf16.mxu1 %v3376_v36 }
 0x188   : > { %3347 = vmatpush3.bf16.msra.mxu0 %v3346_v53 }
 0x189   : > { %3379 = vmatpush3.bf16.msra.mxu1 %v3378_v41  ;;  %3349 = vmatprep.subr.bf16.mxu0 %v3348_v42 }
 0x18a   : > { %v2352_v46 = vpop.f32.mrb[0].mxu0  ;;  %3381 = vmatprep.subr.bf16.mxu1 %v3380_v48 }
 0x18b   : > { %v2387_v1 = vpop.f32.mrb[0].mxu1  ;;  %v2353_v2 = vpop.f32.mrb[1].mxu0 }
 0x18c   : > { %v2354_v5 = vadd.f32 %v2353_v2, %v2352_v46  ;;  %v2388_v6 = vpop.f32.mrb[1].mxu1  ;;  %3351 = vmatpush3.bf16.msra.mxu0 %v3350_v56 }
 0x18d   : > { %v2389_v9 = vadd.f32 %v2388_v6, %v2387_v1  ;;  %3383 = vmatpush3.bf16.msra.mxu1 %v3382_v57  ;;  %3353 = vmatprep.subr.bf16.mxu0 %v3352_v59 }
 0x18e   : > { %3385 = vmatprep.subr.bf16.mxu1 %v3384_v62 }
 0x18f   : > { %v1164_v18 = vadd.f32 %v2389_v9, %v2354_v5 }
 0x190   : > { %3355 = vmatpush3.bf16.msra.mxu0 %v3354_v7 }
 0x191   : > { %3387 = vmatpush3.bf16.msra.mxu1 %v3386_v8  ;;  %3357 = vmatprep.subr.bf16.mxu0 %v3356_v10  ;;  %v330_v10 = vld [vmem:[#allocation2] sm:$0x3] }
 0x192   : > { %3389 = vmatprep.subr.bf16.mxu1 %v3388_v15 }
 0x194   : > { %3359 = vmatpush3.bf16.msra.mxu0 %v3358_v19 }
 0x195   : > { %3391 = vmatpush3.bf16.msra.mxu1 %v3390_v16 }
 0x197   : > { %2072 = vmatmul.mubr.f32.vlgmr.msra.gmra.mrb[14].mxu0 %v4476_v52 }
 0x198   : > { %2142 = vmatmul.mubr.f32.vlgmr.msra.gmra.mrb[14].mxu1 %v4481_v55 }
 0x1aa   : > { %v2422_v20 = vpop.f32.mrb[2].mxu0 }
 0x1ab   : > { %v2423_v21 = vpop.f32.mrb[3].mxu0  ;;  %v2457_v22 = vpop.f32.mrb[2].mxu1 }
 0x1ac   : > { %v2424_v23 = vadd.f32 %v2423_v21, %v2422_v20  ;;  %v2458_v24 = vpop.f32.mrb[3].mxu1  ;;  %v2176_v21 = vstv (!%p2312_p5), %s2175_s4 }
 0x1ad   : > { %v2459_v25 = vadd.f32 %v2458_v24, %v2457_v22 }
 0x1ae   : > { %v1234_v26 = vadd.f32 %v2424_v23, %v1164_v18  ;;  %v2314_v18 = vld [vmem:[#allocation9] ss:$0 sm:$0xff] (!%p2312_p5) }
 0x1b0   : > { %v1304_v27 = vadd.f32 %v2459_v25, %v1234_v26 }
 0x1ca   : > { %v2492_v28 = vpop.f32.mrb[4].mxu0 }
 0x1cb   : > { %v2493_v29 = vpop.f32.mrb[5].mxu0  ;;  %v2527_v30 = vpop.f32.mrb[4].mxu1 }
 0x1cc   : > { %v2494_v31 = vadd.f32 %v2493_v29, %v2492_v28  ;;  %v2528_v32 = vpop.f32.mrb[5].mxu1 }
 0x1cd   : > { %v2529_v33 = vadd.f32 %v2528_v32, %v2527_v30 }
 0x1ce   : > { %v1374_v35 = vadd.f32 %v2494_v31, %v1304_v27 }
 0x1d0   : > { %v1444_v36 = vadd.f32 %v2529_v33, %v1374_v35 }
 0x1ea   : > { %v2562_v37 = vpop.f32.mrb[6].mxu0 }
 0x1eb   : > { %v2563_v52 = vpop.f32.mrb[7].mxu0  ;;  %v2597_v38 = vpop.f32.mrb[6].mxu1 }
 0x1ec   : > { %v2564_v55 = vadd.f32 %v2563_v52, %v2562_v37  ;;  %v2598_v43 = vpop.f32.mrb[7].mxu1 }
 0x1ed   : > { %v2599_v39 = vadd.f32 %v2598_v43, %v2597_v38 }
 0x1ee   : > { %v1514_v40 = vadd.f32 %v2564_v55, %v1444_v36 }
 0x1f0   : > { %v1584_v53 = vadd.f32 %v2599_v39, %v1514_v40 }
 0x20a   : > { %v2632_v41 = vpop.f32.mrb[8].mxu0 }
 0x20b   : > { %v2633_v42 = vpop.f32.mrb[9].mxu0  ;;  %v2667_v44 = vpop.f32.mrb[8].mxu1 }
 0x20c   : > { %v2634_v45 = vadd.f32 %v2633_v42, %v2632_v41  ;;  %v2668_v47 = vpop.f32.mrb[9].mxu1 }
 0x20d   : > { %v2669_v48 = vadd.f32 %v2668_v47, %v2667_v44 }
 0x20e   : > { %v1654_v49 = vadd.f32 %v2634_v45, %v1584_v53 }
 0x210   : > { %v1724_v50 = vadd.f32 %v2669_v48, %v1654_v49 }
 0x22a   : > { %v2702_v51 = vpop.f32.mrb[10].mxu0 }
 0x22b   : > { %v2703_v54 = vpop.f32.mrb[11].mxu0  ;;  %v2737_v34 = vpop.f32.mrb[10].mxu1 }
 0x22c   : > { %v2704_v56 = vadd.f32 %v2703_v54, %v2702_v51  ;;  %v2738_v57 = vpop.f32.mrb[11].mxu1 }
 0x22d   : > { %v2739_v59 = vadd.f32 %v2738_v57, %v2737_v34 }
 0x22e   : > { %v1794_v60 = vadd.f32 %v2704_v56, %v1724_v50 }
 0x230   : > { %v1864_v61 = vadd.f32 %v2739_v59, %v1794_v60 }
 0x24a   : > { %v2772_v58 = vpop.f32.mrb[12].mxu0 }
 0x24b   : > { %v2773_v46 = vpop.f32.mrb[13].mxu0  ;;  %v2807_v62 = vpop.f32.mrb[12].mxu1 }
 0x24c   : > { %v2774_v63 = vadd.f32 %v2773_v46, %v2772_v58  ;;  %v2808_v14 = vpop.f32.mrb[13].mxu1 }
 0x24d   : > { %v2809_v0 = vadd.f32 %v2808_v14, %v2807_v62 }
 0x24e   : > { %v1934_v1 = vadd.f32 %v2774_v63, %v1864_v61 }
 0x250   : > { %v2004_v2 = vadd.f32 %v2809_v0, %v1934_v1 }
 0x26a   : > { %v2842_v3 = vpop.f32.mrb[14].mxu0 }
 0x26b   : > { %v2843_v4 = vpop.f32.mrb[15].mxu0  ;;  %v2877_v5 = vpop.f32.mrb[14].mxu1 }
 0x26c   : > { %v2844_v6 = vadd.f32 %v2843_v4, %v2842_v3  ;;  %v2878_v7 = vpop.f32.mrb[15].mxu1 }
 0x26d   : > { %v2879_v9 = vadd.f32 %v2878_v7, %v2877_v5 }
 0x26e   : > { %v2074_v8 = vadd.f32 %v2844_v6, %v2004_v2  ;;  %2152 = sbr.rel (%p2312_p5) target bundleno = 788 (0x314), region = 64 }
 0x270   : > { %v2144_v11 = vadd.f32 %v2879_v9, %v2074_v8 }
 0x272   : > { %v2147_v13 = vadd.f32 %v2144_v11, %v330_v10 }
 0x274   : > { %2148 = vst [vmem:[#allocation2] sm:$0x3] %v2147_v13 }
 0x27b   : > { %v2153_v15 = vld [vmem:[#allocation2] sm:$0x3] }
 0x27c   : > { %v2161_v17 = vadd.f32 %v2313_v12, %v2153_v15 }
 0x27e   : > { %v2162_v19 = vmax.f32 %v2161_v17, 0.0 }
 0x280   : > { %v2170_v16 = vmul.f32 %v2314_v18, %v2162_v19 }
 0x282   : > { %v2172_v20 = vsel %vm2171_vm0, %v2170_v16, 0.0 }
 0x283   : > { %2173 = vadd.xlane.f32.xlu0 %v2172_v20 }
 0x310   : > { %v2174_v22 = vpop.xlane.xlu0 %2173 }
 0x311   : > { %v2177_v23 = vadd.f32 %v2176_v21, %v2174_v22 }
 0x313   : > { %2179 = vst.msk [vmem:[%s4570_s5] sm:$0x3] %vm2178_vm1, %v2177_v23 }
 0x314 PF: > { %s23_s25 = sadd.s32 1, %s3663_s25   ;;  %s4583_s23 = smov %s3828_s20 }
 0x315   : > { %p20_p10 = scmp.ge.s32.totalorder %s23_s25, 4   ;;  %s4584_s20 = smov %s3647_s21 }
 0x316   : > { %s4585_s21 = smov %s3651_s22  ;;  %s4586_s22 = smov %s4583_s23 }
 0x317   : > { %s4587_s23 = smov %s3659_s24  ;;  %s4588_s24 = smov %s4590_s16 }
 0x318   :  { %22 = sbr.rel (!%p20_p10) target bundleno = 9 (0x9), region = 109 }
 0x31f   :  { %2199 = vsyncpa [#allocation5], 1 }
 0x320   :  { %2201 = vsyncpa [#allocation5 + $0x1], 1 }
 0x321   :  { %2202 = vsyncpa [#allocation7], 1 }
 0x322   :  { %2204 = vsyncpa [#allocation7 + $0x1], 1 }
 0x323   :  { %2205 = vsyncpa [#allocation10], 1 }

</bundles_post_ra>
